<compile_context>
chip_gen: v7x
topology: tpu7x:2x2x1
jax: 0.10.0
libtpu: 0.0.40
codegen_flags: <defaults>
</compile_context>

<pallas_src>
import jax
import jax.numpy as jnp
from jax import lax
from jax.experimental import pallas as pl
from jax.experimental.pallas import tpu as pltpu

_BN_EPS = 1e-5


def _nl_attn_kernel(theta_ref, phi_ref, g_ref, x_ref, ww_ref, bw_ref, o_ref,
                    m_ref, l_ref, acc_ref):
    """Attention core for one (batch, query-tile, key-tile) grid step.

    theta_ref : (ic, tq)  bf16   query projection tile
    phi_ref   : (ic, tk)  bf16   key projection tile (pooled, compacted)
    g_ref     : (ic, tk)  bf16   value projection tile (pooled, compacted)
    x_ref     : (C,  tq)  x-dtype residual tile
    ww_ref    : (C,  ic)  f32    output 1x1 conv weight with eval-BN folded in
    bw_ref    : (C,  1)   f32    folded bias
    o_ref     : (C,  tq)  output tile
    scratch   : m (tq,1), l (tq,1), acc (tq, ic)  -- online softmax state
    """
    f32 = jnp.float32
    k = pl.program_id(2)
    nk = pl.num_programs(2)

    @pl.when(k == 0)
    def _():
        m_ref[...] = jnp.full(m_ref.shape, -jnp.inf, m_ref.dtype)
        l_ref[...] = jnp.zeros(l_ref.shape, l_ref.dtype)
        acc_ref[...] = jnp.zeros(acc_ref.shape, acc_ref.dtype)

    # f[n, m] = sum_c theta[c, n] * phi[c, m]  -> (tq, tk); bf16 MXU, f32 acc.
    f = lax.dot_general(theta_ref[...], phi_ref[...],
                        (((0,), (0,)), ((), ())),
                        preferred_element_type=f32)

    # Online softmax (all element-wise math in f32).
    m_prev = m_ref[...]
    m_new = jnp.maximum(m_prev, jnp.max(f, axis=-1, keepdims=True))   # (tq, 1)
    alpha = jnp.exp(m_prev - m_new)                                   # (tq, 1)
    e = jnp.exp(f - m_new)                                            # (tq, tk)
    l_ref[...] = alpha * l_ref[...] + jnp.sum(e, axis=-1, keepdims=True)
    # acc[n, c] += sum_m e[n, m] * g[c, m]   (bf16 MXU operands, f32 accumulate)
    acc_ref[...] = alpha * acc_ref[...] + lax.dot_general(
        e.astype(g_ref.dtype), g_ref[...], (((1,), (1,)), ((), ())),
        preferred_element_type=f32)
    m_ref[...] = m_new

    @pl.when(k == nk - 1)
    def _():
        # Deferred softmax normalization on the small (tq, ic) accumulator.
        inv = pl.reciprocal(l_ref[...], approx=True)                  # (tq, 1)
        y_t = acc_ref[...] * inv                                      # (tq, ic)
        # Output 1x1 conv with eval-mode BN folded in: (C, ic) x (tq, ic)^T.
        w_y = lax.dot_general(ww_ref[...], y_t, (((1,), (1,)), ((), ())),
                              preferred_element_type=f32)             # (C, tq)
        o_ref[...] = (w_y + bw_ref[...] + x_ref[...].astype(f32)).astype(o_ref.dtype)


def nonlocal_block(x, params, *, sub_sample=True, compute_dtype=jnp.bfloat16):
    """x: (B, C, H, W). params: conv weights/biases + eval-mode BN stats."""
    B, C, H, W = x.shape
    N = H * W
    if sub_sample:
        assert H % 2 == 0 and W % 2 == 0, "MaxPool2d(2,2) path assumes even H, W"
    f32 = jnp.float32
    ic = params["w_theta"].shape[0]

    xf = x.reshape(B, C, N)
    xf32 = xf.astype(f32)

    def conv1x1(w4, b):
        w = w4.reshape(w4.shape[0], w4.shape[1]).astype(f32)
        return jnp.einsum("oc,bcn->bon", w, xf32) + b.astype(f32)[None, :, None]

    # Hoisted 1x1 convs (computed once per batch element, not once per q tile).
    theta = conv1x1(params["w_theta"], params["b_theta"])          # (B, ic, N)
    phi = conv1x1(params["w_phi"], params["b_phi"])                # (B, ic, N)
    g = conv1x1(params["w_g"], params["b_g"])                      # (B, ic, N)

    if sub_sample:
        def pool(v):
            v = v.reshape(B, ic, H // 2, 2, W // 2, 2)
            return jnp.max(v, axis=(3, 5)).reshape(B, ic, (H // 2) * (W // 2))
        phi = pool(phi)
        g = pool(g)
    Np = phi.shape[-1]

    # bf16 MXU operands (f32 accumulation happens inside the kernel).
    theta = theta.astype(compute_dtype)
    phi = phi.astype(compute_dtype)
    g = g.astype(compute_dtype)

    # Fold eval-mode BatchNorm2d into the output 1x1 conv (exact).
    scale = (params["gamma"].astype(f32)
             * lax.rsqrt(params["var"].astype(f32) + _BN_EPS))
    ww = params["w_w"].reshape(C, ic).astype(f32) * scale[:, None]
    bw = ((params["b_w"].astype(f32) - params["mean"].astype(f32)) * scale
          + params["beta"].astype(f32)).reshape(C, 1)

    # ----- query tile: largest lane-dense tile, but keep >= 2 blocks for v7x. -----
    q_cands = [c for c in (512, 256, 128) if N % c == 0]
    if q_cands:
        tq = q_cands[0]
        if B * (N // tq) < 2:
            for c in q_cands:
                if N // c >= 2:
                    tq = c
                    break
    else:
        tq = N  # TODO(synk): pad N to a multiple of 128 for lane-dense tiling.
    num_q = N // tq

    # ----- key tile: bound the live (tq, tk) score tile independent of Np. -----
    tk = Np
    if Np > 2048:
        for c in (2048, 1024, 512, 256, 128):
            if Np % c == 0:
                tk = c
                break
    num_k = Np // tk

    # VMEM budget: <=48 MiB on v7x (64 MiB physical), ~96 MiB on v5e/v6e.
    try:
        info = pltpu.get_tpu_info()
        cap = getattr(info, "vmem_capacity_bytes", 128 * 1024 * 1024)
        vmem_limit = min(96 * 1024 * 1024, (cap * 3) // 4)
    except Exception:  # pragma: no cover - conservative fallback
        vmem_limit = 64 * 1024 * 1024

    out = pl.pallas_call(
        _nl_attn_kernel,
        out_shape=jax.ShapeDtypeStruct((B, C, N), x.dtype),
        grid=(B, num_q, num_k),
        in_specs=[
            pl.BlockSpec((None, ic, tq), lambda b, q, k: (b, 0, q)),   # theta
            pl.BlockSpec((None, ic, tk), lambda b, q, k: (b, 0, k)),   # phi
            pl.BlockSpec((None, ic, tk), lambda b, q, k: (b, 0, k)),   # g
            pl.BlockSpec((None, C, tq), lambda b, q, k: (b, 0, q)),    # x residual
            pl.BlockSpec((C, ic), lambda b, q, k: (0, 0)),             # ww (BN folded)
            pl.BlockSpec((C, 1), lambda b, q, k: (0, 0)),              # bw (BN folded)
        ],
        out_specs=pl.BlockSpec((None, C, tq), lambda b, q, k: (b, 0, q)),
        scratch_shapes=[
            pltpu.VMEM((tq, 1), jnp.float32),    # running max m
            pltpu.VMEM((tq, 1), jnp.float32),    # running denom l
            pltpu.VMEM((tq, ic), jnp.float32),   # un-normalized y accumulator
        ],
        compiler_params=pltpu.CompilerParams(
            dimension_semantics=("parallel", "parallel", "arbitrary"),
            vmem_limit_bytes=int(vmem_limit),
        ),
    )(theta, phi, g, xf, ww, bw)
    return out.reshape(B, C, H, W)


# ----------------------- plain-JAX reference (for checking) -----------------------
def nonlocal_block_ref(x, params, *, sub_sample=True):
    B, C, H, W = x.shape
    ic = params["w_theta"].shape[0]
    N = H * W
    xf = x.reshape(B, C, N).astype(jnp.float32)

    def conv1x1(w4, b, inp):
        w = w4.reshape(w4.shape[0], w4.shape[1]).astype(jnp.float32)
        return jnp.einsum("oc,bcn->bon", w, inp) + b.astype(jnp.float32)[None, :, None]

    theta = conv1x1(params["w_theta"], params["b_theta"], xf)   # (B, ic, N)
    phi = conv1x1(params["w_phi"], params["b_phi"], xf)
    g = conv1x1(params["w_g"], params["b_g"], xf)

    if sub_sample:
        def pool(v):
            v = v.reshape(B, ic, H // 2, 2, W // 2, 2)
            return jnp.max(v, axis=(3, 5)).reshape(B, ic, (H // 2) * (W // 2))
        phi = pool(phi)
        g = pool(g)

    f = jnp.einsum("bcn,bcm->bnm", theta, phi)
    p = jax.nn.softmax(f, axis=-1)
    y = jnp.einsum("bnm,bcm->bcn", p, g)                        # (B, ic, N)

    wy = conv1x1(params["w_w"], params["b_w"], y)               # (B, C, N)
    scale = params["gamma"] / jnp.sqrt(params["var"] + _BN_EPS)
    wy = ((wy - params["mean"][None, :, None]) * scale[None, :, None]
          + params["beta"][None, :, None])
    return (wy + xf).reshape(B, C, H, W).astype(x.dtype)


if __name__ == "__main__":
    key = jax.random.PRNGKey(0)
    ks = jax.random.split(key, 12)
    B, C, H, W = 2, 4, 16, 16
    ic = max(C // 2, 1)

    x = jax.random.normal(ks[0], (B, C, H, W), jnp.float32)
    params = dict(
        # Conv2d weights in PyTorch (out, in, 1, 1) layout, with biases.
        w_theta=0.2 * jax.random.normal(ks[1], (ic, C, 1, 1), jnp.float32),
        b_theta=0.1 * jax.random.normal(ks[2], (ic,), jnp.float32),
        w_phi=0.2 * jax.random.normal(ks[3], (ic, C, 1, 1), jnp.float32),
        b_phi=0.1 * jax.random.normal(ks[4], (ic,), jnp.float32),
        w_g=0.2 * jax.random.normal(ks[5], (ic, C, 1, 1), jnp.float32),
        b_g=0.1 * jax.random.normal(ks[6], (ic,), jnp.float32),
        w_w=0.2 * jax.random.normal(ks[7], (C, ic, 1, 1), jnp.float32),
        b_w=0.1 * jax.random.normal(ks[8], (C,), jnp.float32),
        # Eval-mode BatchNorm2d stats. (PyTorch init sets gamma=beta=0, which
        # makes the block an identity; use non-trivial values so the test is
        # meaningful.)
        gamma=1.0 + 0.1 * jax.random.normal(ks[9], (C,), jnp.float32),
        beta=0.1 * jax.random.normal(ks[10], (C,), jnp.float32),
        mean=0.1 * jax.random.normal(ks[11], (C,), jnp.float32),
        var=jnp.ones((C,), jnp.float32),
    )

    out = jax.block_until_ready(nonlocal_block(x, params, sub_sample=True))
    ref = jax.block_until_ready(nonlocal_block_ref(x, params, sub_sample=True))

    assert out.shape == (B, C, H, W)
    err = float(jnp.max(jnp.abs(out - ref)))
    # Attention matmuls use bf16 MXU operands (f32 accumulation), so the
    # tolerance is looser than a pure-f32 comparison.
    assert jnp.allclose(out, ref, rtol=2e-2, atol=2e-2), err
    print("KERNEL_OK")
</pallas_src>

<mosaic_0001>
module attributes {stable_mosaic.version = 11 : i64} {
  func.func @_nl_attn_kernel(%arg0: i32, %arg1: i32, %arg2: i32, %arg3: memref<1x2x256xbf16, #tpu.memory_space<vmem>>, %arg4: memref<1x2x64xbf16, #tpu.memory_space<vmem>>, %arg5: memref<1x2x64xbf16, #tpu.memory_space<vmem>>, %arg6: memref<1x4x256xf32, #tpu.memory_space<vmem>>, %arg7: memref<4x2xf32, #tpu.memory_space<vmem>>, %arg8: memref<4x1xf32, #tpu.memory_space<vmem>>, %arg9: memref<1x4x256xf32, #tpu.memory_space<vmem>>, %arg10: memref<256x1xf32, #tpu.memory_space<vmem>>, %arg11: memref<256x1xf32, #tpu.memory_space<vmem>>, %arg12: memref<256x2xf32, #tpu.memory_space<vmem>>) attributes {dimension_semantics = [#tpu.dimension_semantics<parallel>, #tpu.dimension_semantics<parallel>, #tpu.dimension_semantics<arbitrary>], iteration_bounds = array<i64: 2, 1, 1>, scalar_prefetch = 0 : i64, scratch_operands = 3 : i64, tpu.core_type = #tpu.core_type<tc>, window_params = [{transform_indices = @transform_0, window_bounds = array<i64: 1, 2, 256>}, {transform_indices = @transform_1, window_bounds = array<i64: 1, 2, 64>}, {transform_indices = @transform_2, window_bounds = array<i64: 1, 2, 64>}, {transform_indices = @transform_3, window_bounds = array<i64: 1, 4, 256>}, {pipeline_mode = #tpu.pipeline_mode<synchronous>, transform_indices = @transform_4, window_bounds = array<i64: 4, 2>}, {pipeline_mode = #tpu.pipeline_mode<synchronous>, transform_indices = @transform_5, window_bounds = array<i64: 4, 1>}, {transform_indices = @transform_6, window_bounds = array<i64: 1, 4, 256>}]} {
    %c0_i32 = arith.constant 0 : i32
    %0 = arith.cmpi eq, %arg2, %c0_i32 : i32
    %1 = arith.extui %0 : i1 to i32
    %c0_i32_0 = arith.constant 0 : i32
    %2 = arith.cmpi ne, %1, %c0_i32_0 : i32
    scf.if %2 {
      %cst_26 = arith.constant 0xFF800000 : f32
      %36 = vector.broadcast %cst_26 : f32 to vector<256x1xf32>
      %c0_27 = arith.constant 0 : index
      %c0_28 = arith.constant 0 : index
      %37 = vector.load %arg10[%c0_27, %c0_28] : memref<256x1xf32, #tpu.memory_space<vmem>>, vector<256x1xf32>
      tpu.vector_store %arg10[%c0_27, %c0_28], %36 {strides = array<i32>} : memref<256x1xf32, #tpu.memory_space<vmem>>, vector<256x1xf32>,
      %cst_29 = arith.constant 0.000000e+00 : f32
      %38 = vector.broadcast %cst_29 : f32 to vector<256x1xf32>
      %c0_30 = arith.constant 0 : index
      %c0_31 = arith.constant 0 : index
      %39 = vector.load %arg11[%c0_30, %c0_31] : memref<256x1xf32, #tpu.memory_space<vmem>>, vector<256x1xf32>
      tpu.vector_store %arg11[%c0_30, %c0_31], %38 {strides = array<i32>} : memref<256x1xf32, #tpu.memory_space<vmem>>, vector<256x1xf32>,
      %cst_32 = arith.constant 0.000000e+00 : f32
      %40 = vector.broadcast %cst_32 : f32 to vector<256x2xf32>
      %c0_33 = arith.constant 0 : index
      %c0_34 = arith.constant 0 : index
      %41 = vector.load %arg12[%c0_33, %c0_34] : memref<256x2xf32, #tpu.memory_space<vmem>>, vector<256x2xf32>
      tpu.vector_store %arg12[%c0_33, %c0_34], %40 {strides = array<i32>} : memref<256x2xf32, #tpu.memory_space<vmem>>, vector<256x2xf32>,
    } else {
    }
    %c0 = arith.constant 0 : index
    %c0_1 = arith.constant 0 : index
    %c0_2 = arith.constant 0 : index
    %3 = vector.load %arg3[%c0, %c0_1, %c0_2] : memref<1x2x256xbf16, #tpu.memory_space<vmem>>, vector<1x2x256xbf16>
    %4 = vector.shape_cast %3 : vector<1x2x256xbf16> to vector<2x256xbf16>
    %c0_3 = arith.constant 0 : index
    %c0_4 = arith.constant 0 : index
    %c0_5 = arith.constant 0 : index
    %5 = vector.load %arg4[%c0_3, %c0_4, %c0_5] : memref<1x2x64xbf16, #tpu.memory_space<vmem>>, vector<1x2x64xbf16>
    %6 = vector.shape_cast %5 : vector<1x2x64xbf16> to vector<2x64xbf16>
    %cst = arith.constant dense<0.000000e+00> : vector<256x64xf32>
    %7 = tpu.matmul %4, %6, %cst {dimension_numbers = #tpu.dot_dimension_numbers<[0], [0], [1], [1], [0, 1, 1, 1], [], []>} : vector<2x256xbf16>, vector<2x64xbf16>, vector<256x64xf32> -> vector<256x64xf32>
    %c0_6 = arith.constant 0 : index
    %c0_7 = arith.constant 0 : index
    %8 = vector.load %arg10[%c0_6, %c0_7] : memref<256x1xf32, #tpu.memory_space<vmem>>, vector<256x1xf32>
    %cst_8 = arith.constant dense<0xFF800000> : vector<256xf32>
    %9 = vector.multi_reduction <maximumf>, %7, %cst_8 [1] : vector<256x64xf32> to vector<256xf32>
    %10 = vector.shape_cast %9 : vector<256xf32> to vector<256x1xf32>
    %11 = arith.maximumf %8, %10 : vector<256x1xf32>
    %12 = arith.subf %8, %11 : vector<256x1xf32>
    %13 = math.exp %12 : vector<256x1xf32>
    %14 = vector.broadcast %11 : vector<256x1xf32> to vector<256x64xf32>
    %15 = arith.subf %7, %14 : vector<256x64xf32>
    %16 = math.exp %15 : vector<256x64xf32>
    %c0_9 = arith.constant 0 : index
    %c0_10 = arith.constant 0 : index
    %17 = vector.load %arg11[%c0_9, %c0_10] : memref<256x1xf32, #tpu.memory_space<vmem>>, vector<256x1xf32>
    %18 = arith.mulf %13, %17 : vector<256x1xf32>
    %cst_11 = arith.constant dense<0.000000e+00> : vector<256xf32>
    %19 = vector.multi_reduction <add>, %16, %cst_11 [1] : vector<256x64xf32> to vector<256xf32>
    %20 = vector.shape_cast %19 : vector<256xf32> to vector<256x1xf32>
    %21 = arith.addf %18, %20 : vector<256x1xf32>
    %c0_12 = arith.constant 0 : index
    %c0_13 = arith.constant 0 : index
    %22 = vector.load %arg11[%c0_12, %c0_13] : memref<256x1xf32, #tpu.memory_space<vmem>>, vector<256x1xf32>
    tpu.vector_store %arg11[%c0_12, %c0_13], %21 {strides = array<i32>} : memref<256x1xf32, #tpu.memory_space<vmem>>, vector<256x1xf32>,
    %c0_14 = arith.constant 0 : index
    %c0_15 = arith.constant 0 : index
    %23 = vector.load %arg12[%c0_14, %c0_15] : memref<256x2xf32, #tpu.memory_space<vmem>>, vector<256x2xf32>
    %24 = vector.broadcast %13 : vector<256x1xf32> to vector<256x2xf32>
    %25 = arith.mulf %24, %23 : vector<256x2xf32>
    %26 = arith.truncf %16 : vector<256x64xf32> to vector<256x64xbf16>
    %c0_16 = arith.constant 0 : index
    %c0_17 = arith.constant 0 : index
    %c0_18 = arith.constant 0 : index
    %27 = vector.load %arg5[%c0_16, %c0_17, %c0_18] : memref<1x2x64xbf16, #tpu.memory_space<vmem>>, vector<1x2x64xbf16>
    %28 = vector.shape_cast %27 : vector<1x2x64xbf16> to vector<2x64xbf16>
    %cst_19 = arith.constant dense<0.000000e+00> : vector<256x2xf32>
    %29 = tpu.matmul %26, %28, %cst_19 {dimension_numbers = #tpu.dot_dimension_numbers<[1], [1], [0], [0], [0, 0, 1, 0], [], []>} : vector<256x64xbf16>, vector<2x64xbf16>, vector<256x2xf32> -> vector<256x2xf32>
    %30 = arith.addf %25, %29 : vector<256x2xf32>
    %c0_20 = arith.constant 0 : index
    %c0_21 = arith.constant 0 : index
    %31 = vector.load %arg12[%c0_20, %c0_21] : memref<256x2xf32, #tpu.memory_space<vmem>>, vector<256x2xf32>
    tpu.vector_store %arg12[%c0_20, %c0_21], %30 {strides = array<i32>} : memref<256x2xf32, #tpu.memory_space<vmem>>, vector<256x2xf32>,
    %c0_22 = arith.constant 0 : index
    %c0_23 = arith.constant 0 : index
    %32 = vector.load %arg10[%c0_22, %c0_23] : memref<256x1xf32, #tpu.memory_space<vmem>>, vector<256x1xf32>
    tpu.vector_store %arg10[%c0_22, %c0_23], %11 {strides = array<i32>} : memref<256x1xf32, #tpu.memory_space<vmem>>, vector<256x1xf32>,
    %c0_i32_24 = arith.constant 0 : i32
    %33 = arith.cmpi eq, %arg2, %c0_i32_24 : i32
    %34 = arith.extui %33 : i1 to i32
    %c0_i32_25 = arith.constant 0 : i32
    %35 = arith.cmpi ne, %34, %c0_i32_25 : i32
    scf.if %35 {
      %c0_26 = arith.constant 0 : index
      %c0_27 = arith.constant 0 : index
      %36 = vector.load %arg11[%c0_26, %c0_27] : memref<256x1xf32, #tpu.memory_space<vmem>>, vector<256x1xf32>
      %37 = tpu.reciprocal %36 {approx = true} : vector<256x1xf32> -> vector<256x1xf32>
      %c0_28 = arith.constant 0 : index
      %c0_29 = arith.constant 0 : index
      %38 = vector.load %arg12[%c0_28, %c0_29] : memref<256x2xf32, #tpu.memory_space<vmem>>, vector<256x2xf32>
      %39 = vector.broadcast %37 : vector<256x1xf32> to vector<256x2xf32>
      %40 = arith.mulf %38, %39 : vector<256x2xf32>
      %c0_30 = arith.constant 0 : index
      %c0_31 = arith.constant 0 : index
      %41 = vector.load %arg7[%c0_30, %c0_31] : memref<4x2xf32, #tpu.memory_space<vmem>>, vector<4x2xf32>
      %cst_32 = arith.constant dense<0.000000e+00> : vector<4x256xf32>
      %42 = tpu.matmul %41, %40, %cst_32 {dimension_numbers = #tpu.dot_dimension_numbers<[1], [1], [0], [0], [0, 0, 1, 0], [], []>} : vector<4x2xf32>, vector<256x2xf32>, vector<4x256xf32> -> vector<4x256xf32>
      %c0_33 = arith.constant 0 : index
      %c0_34 = arith.constant 0 : index
      %43 = vector.load %arg8[%c0_33, %c0_34] : memref<4x1xf32, #tpu.memory_space<vmem>>, vector<4x1xf32>
      %44 = vector.broadcast %43 : vector<4x1xf32> to vector<4x256xf32>
      %45 = arith.addf %42, %44 : vector<4x256xf32>
      %c0_35 = arith.constant 0 : index
      %c0_36 = arith.constant 0 : index
      %c0_37 = arith.constant 0 : index
      %46 = vector.load %arg6[%c0_35, %c0_36, %c0_37] : memref<1x4x256xf32, #tpu.memory_space<vmem>>, vector<1x4x256xf32>
      %47 = vector.shape_cast %46 : vector<1x4x256xf32> to vector<4x256xf32>
      %48 = arith.addf %45, %47 : vector<4x256xf32>
      %c0_38 = arith.constant 0 : index
      %c0_39 = arith.constant 0 : index
      %c0_40 = arith.constant 0 : index
      %49 = vector.load %arg9[%c0_38, %c0_39, %c0_40] : memref<1x4x256xf32, #tpu.memory_space<vmem>>, vector<1x4x256xf32>
      %50 = vector.shape_cast %49 : vector<1x4x256xf32> to vector<4x256xf32>
      %51 = vector.shape_cast %48 : vector<4x256xf32> to vector<1x4x256xf32>
      tpu.vector_store %arg9[%c0_38, %c0_39, %c0_40], %51 {strides = array<i32>} : memref<1x4x256xf32, #tpu.memory_space<vmem>>, vector<1x4x256xf32>,
    } else {
    }
    return
  }
  func.func @transform_0(%arg0: i32, %arg1: i32, %arg2: i32) -> (i32, i32, i32) {
    %c0_i32 = arith.constant 0 : i32
    %c0_i32_0 = arith.constant 0 : i32
    return %arg0, %c0_i32, %arg1 : i32, i32, i32
  }
  func.func @transform_1(%arg0: i32, %arg1: i32, %arg2: i32) -> (i32, i32, i32) {
    %c0_i32 = arith.constant 0 : i32
    %c0_i32_0 = arith.constant 0 : i32
    return %arg0, %c0_i32, %arg2 : i32, i32, i32
  }
  func.func @transform_2(%arg0: i32, %arg1: i32, %arg2: i32) -> (i32, i32, i32) {
    %c0_i32 = arith.constant 0 : i32
    %c0_i32_0 = arith.constant 0 : i32
    return %arg0, %c0_i32, %arg2 : i32, i32, i32
  }
  func.func @transform_3(%arg0: i32, %arg1: i32, %arg2: i32) -> (i32, i32, i32) {
    %c0_i32 = arith.constant 0 : i32
    %c0_i32_0 = arith.constant 0 : i32
    return %arg0, %c0_i32, %arg1 : i32, i32, i32
  }
  func.func @transform_4(%arg0: i32, %arg1: i32, %arg2: i32) -> (i32, i32) {
    %c0_i32 = arith.constant 0 : i32
    %c0_i32_0 = arith.constant 0 : i32
    %c0_i32_1 = arith.constant 0 : i32
    return %c0_i32, %c0_i32_0 : i32, i32
  }
  func.func @transform_5(%arg0: i32, %arg1: i32, %arg2: i32) -> (i32, i32) {
    %c0_i32 = arith.constant 0 : i32
    %c0_i32_0 = arith.constant 0 : i32
    %c0_i32_1 = arith.constant 0 : i32
    return %c0_i32, %c0_i32_0 : i32, i32
  }
  func.func @transform_6(%arg0: i32, %arg1: i32, %arg2: i32) -> (i32, i32, i32) {
    %c0_i32 = arith.constant 0 : i32
    %c0_i32_0 = arith.constant 0 : i32
    return %arg0, %c0_i32, %arg1 : i32, i32, i32
  }
}

</mosaic_0001>

<bundles_post_ra>
// kernel: tpu_custom_call.1
= control target key start
LH: loop header
LB: loop body
LE: loop exit
PB: predicated region body
PF: predicated region fallthrough
CT: control target
= control target key end

     0   :  { %s5063_s0 = inlined_call_operand.hbm [shape: bf16[2,2,256], index: 0, kind: input, shape index: {}]   ;;  %s5064_s1 = inlined_call_operand.hbm [shape: bf16[2,2,64], index: 1, kind: input, shape index: {}]   ;;  %s5065_s2 = inlined_call_operand.hbm [shape: bf16[2,2,64], index: 2, kind: input, shape index: {}]   ;;  %s5066_s3 = inlined_call_operand.hbm [shape: f32[2,4,256], index: 3, kind: input, shape index: {}]   ;;  %s5067_s4 = inlined_call_operand.hbm [shape: f32[4,2], index: 4, kind: input, shape index: {}]   ;;  %s5068_s5 = inlined_call_operand.hbm [shape: f32[4,1], index: 5, kind: input, shape index: {}]   ;;  %s5069_s6 = inlined_call_operand.hbm [shape: f32[2,4,256], index: 6, kind: output, shape index: {}]  }
   0x1   :  { %5111 = sst [smem:[#allocation54_spill]] %s5064_s1 }
   0x2   :  { %5112 = sst [smem:[#allocation55_spill]] %s5067_s4 }
   0x3   :  { %11 = vsyncpa [#allocation6], 0 }
   0x4   :  { %13 = vsyncpa [#allocation6 + $0x1], 0 }
   0x5   :  { %14 = vsyncpa [#allocation9], 0 }
   0x6   :  { %16 = vsyncpa [#allocation9 + $0x1], 0 }
   0x7   :  { %17 = vsyncpa [#allocation12], 0 }
   0x8   :  { %19 = vsyncpa [#allocation12 + $0x1], 0 }
   0x9   :  { %20 = vsyncpa [#allocation15], 0 }
   0xa   :  { %21 = vsyncpa [#allocation7], 0 }
   0xb   :  { %23 = vsyncpa [#allocation7 + $0x1], 0  ;;  %s3663_s21 = smov 0   ;;  %s3665_s22 = smov 0  }
   0xc   :  { %s3667_s23 = smov 0   ;;  %s3669_s24 = smov 0  }
   0xd   :  { %s3671_s25 = smov 0   ;;  %s3673_s26 = smov 0  }
   0xe LB: > { %5113 = sst [smem:[#allocation23_spill]] %s3595_s21  ;;  %s3694_s27 = sadd.s32 4294967295, %s3615_s26   ;;  %s3615_s26 = sphi %s3673_s26, %s29_s26   ;;  %s3611_s25 = sphi %s3671_s25, %s5230_s25   ;;  %s3607_s24 = sphi %s3669_s24, %s5229_s24   ;;  %s3603_s23 = sphi %s3667_s23, %s5225_s23   ;;  %s3599_s22 = sphi %s3665_s22, %s5228_s22   ;;  %s3595_s21 = sphi %s3663_s21, %s5227_s21  }
   0xf   : > { %5114 = sst [smem:[#allocation24_spill]] %s3603_s23  ;;  %s2765_s28 = sadd.s32 4294967294, %s3615_s26  }
  0x10   : > { %p64_p0 = scmp.ne.s32.totalorder %s3603_s23, %s3599_s22  ;;  %p70_p1 = scmp.ne.s32.totalorder %s3599_s22, %s3595_s21 }
  0x11   : > { %p5070_p2 = scmp.eq.s32.totalorder %s3694_s27, 0  ;;  %p222_p3 = scmp.eq.s32.totalorder %s3694_s27, 1 }
  0x12   : > { %p228_p4 = scmp.eq.s32.totalorder %s2765_s28, 1  ;;  %p2766_p6 = scmp.ge.s32.totalorder %s3615_s26, 1 }
  0x13   : > { %p3706_p5 = por %p5070_p2, %p70_p1  ;;  %p3714_p7 = por %p222_p3, %p64_p0 }
  0x14   : > { %p3718_p8 = por %p228_p4, %p70_p1  ;;  %p235_p9 = scmp.lt.s32.totalorder %s3615_s26, 3 }
  0x15   : > { %s5115_s30 = scalar_select %p3706_p5, 1, 0 }
  0x16   : > { %s5116_s7 = scalar_select %p3714_p7, 1, 0 }
  0x17   : > { %s5117_s8 = scalar_select %p3718_p8, 1, 0 }
  0x18   : > { %p3724_p11 = pnand %p2766_p6, %p235_p9  ;;  %s3617_s10 = smov [#allocation13]  }
  0x19   : > { %5118 = sst [smem:[#allocation25_spill]] %s5117_s8  ;;  %s248_s11 = sshll.u32 %s3617_s10, 4  ;;  %s249_s11 = int_to_ptr.vmem [resolvable:$true] %s248_s11 }
  0x1a   : > { %s5119_s9 = scalar_select %p3724_p11, 1, 0 }
  0x1b   : > { %p3062_p12 = pneg %p3724_p11  ;;  %s48_s12 = sadd.s32 1, %s3611_s25 }
  0x1c   : > { %p65_p13 = scmp.eq.s32.totalorder %s3615_s26, 0  ;;  %p3738_p1 = scmp.ge.s32.totalorder %s48_s12, 2 }
  0x1d   : > { %p3734_p3 = pnand %p3062_p12, %p5070_p2  ;;  %s3751_s16 = sand.u32 1, %s3603_s23  }
  0x1e   : > { %s5121_s14 = scalar_select %p3738_p1, 1, 0 }
  0x1f   : > { %s5120_s13 = scalar_select %p3734_p3, 1, 0 }
  0x20   : > { %p3745_p4 = por %p65_p13, %p64_p0  ;;  %s5123_s4 = sld [smem:[#allocation55_spill]] }
  0x21   : > { %p5076_p12 = pneg %p3734_p3 }
  0x22   : > { %s5122_s15 = scalar_select %p3745_p4, 1, 0 }
  0x26   : > { %s3341_s19 = scalar_lea.hbm %s5123_s4, 64 }
  0x27   : > { %p3342_p9 = scmp.ne.s32.totalorder %s5123_s4, %s3341_s19  ;;  %p3348_p13 = scmp.lt.u32.totalorder %s3341_s19, %s5123_s4 }
  0x29   : > { %p3344_p10 = pnand %p5076_p12, %p3342_p9 }
  0x2b   : > { %p3345_p0 = pneg %p3344_p10 }
  0x2d   : > { %p3350_p2 = pnand %p3348_p13, %p3345_p0 }
  0x2f   : > { %3353 = shalt.err (!%p3350_p2)
}
  0x30   : > { %s3354_s8 = scalar_lea.vmem %s249_s11, 64  ;;  %p3362_p5 = scmp.lt.s32.totalorder %s249_s11, %s249_s11 }
  0x31   : > { %p3355_p6 = scmp.ne.s32.totalorder %s249_s11, %s3354_s8  ;;  %p3363_p11 = scmp.lt.s32.totalorder %s3354_s8, %s3354_s8 }
  0x33   : > { %p3357_p8 = pnand %p3355_p6, %p5076_p12  ;;  %p3364_p4 = por %p3363_p11, %p3362_p5 }
  0x35   : > { %p3358_p7 = pneg %p3357_p8 }
  0x37   : > { %p3365_p1 = pnand %p3364_p4, %p3358_p7 }
  0x39   : > { %3368 = shalt.err (!%p3365_p1)
}
  0x3a   : > { %3065 = dma.hbm_to_vmem [thread:$0]  (!%p3734_p3), %s5123_s4, 64, %s249_s11, [#allocation12]  }
  0x3b   : > { %p5124_p2 = scmp.ne.s32.totalorder %s5121_s14, 0  ;;  %p5126_p5 = scmp.ne.s32.totalorder %s5122_s15, 0 }
  0x3c   : > { %p5127_p7 = scmp.lt.s32.totalorder %s3615_s26, 2  ;;  %s2773_s20 = sshll.u32 %s3611_s25, 4 }
  0x3d   : > { %s5232_s12 = smov (%p5124_p2, %s48_s12), 0  ;;  %s5129_s28 = sadd.s32 1, %s3603_s23 }
  0x3e   : > { %5125 = sst [smem:[#allocation26_spill]] %s5232_s12  ;;  %p3783_p8 = pnand %p5127_p7, %p5126_p5 }
  0x3f   : > { %s52_s19 = ssub.s32 %s3611_s25, %s5232_s12  ;;  %s5131_s1 = sld [smem:[#allocation54_spill]] }
  0x40   : > { %s5128_s29 = scalar_select %p3783_p8, 1, 0 }
  0x41   : > { %p55_p10 = scmp.eq.s32.totalorder %s52_s19, 0  ;;  %s294_s15 = scalar_lea.vmem [#allocation8], %s3751_s16 }
  0x42   : > { %s302_s18 = sshll.u32 %s294_s15, 4  ;;  %s3807_s19 = scalar_lea.hbm %s5065_s2, %s2773_s20  ;;  %s3802_s18 = int_to_ptr.vmem [resolvable:$true] %s302_s18 }
  0x43   : > { %s3794_s10 = scalar_select %p55_p10, %s3603_s23, %s5129_s28  }
  0x44   : > { %s5132_s28 = sand.u32 1, %s3615_s26   ;;  %p3817_p1 = pneg %p3783_p8 }
  0x45   : > { %5130 = sst [smem:[#allocation27_spill]] %s3794_s10  ;;  %s3799_s14 = scalar_lea.hbm %s5131_s1, %s2773_s20 }
  0x46   : > { %s3811_s12 = scalar_lea.sflag [#allocation9], %s5132_s28  ;;  %s3369_s10 = scalar_lea.hbm %s3799_s14, 16 }
  0x47   : > { %p3370_p11 = scmp.ne.s32.totalorder %s3799_s14, %s3369_s10  ;;  %s3374_s4 = scalar_lea.hbm %s5131_s1, 32 }
  0x48   : > { %s5133_s17 = scalar_select %p3817_p1, 1, 0 }
  0x49   : > { %p3372_p4 = pnand %p3817_p1, %p3370_p11  ;;  %p3375_p9 = scmp.lt.u32.totalorder %s3799_s14, %s5131_s1 }
  0x4a   : > { %p3376_p0 = scmp.lt.u32.totalorder %s3374_s4, %s3369_s10  ;;  %p3378_p2 = scmp.lt.u32.totalorder %s3369_s10, %s3799_s14 }
  0x4b   : > { %p3373_p6 = pneg %p3372_p4 }
  0x4c   : > { %p3377_p13 = por %p3376_p0, %p3375_p9 }
  0x4e   : > { %p3379_p5 = por %p3378_p2, %p3377_p13 }
  0x50   : > { %p3380_p7 = pnand %p3379_p5, %p3373_p6 }
  0x52   : > { %3383 = shalt.err (!%p3380_p7)
}
  0x53   : > { %s3384_s28 = scalar_lea.vmem %s3802_s18, 16  ;;  %s3618_s11 = smov [#allocation8]  }
  0x54   : > { %p3385_p10 = scmp.ne.s32.totalorder %s3802_s18, %s3384_s28  ;;  %s3389_s15 = sshll.u32 %s3618_s11, 4  ;;  %s3390_s15 = int_to_ptr.vmem [resolvable:$false] %s3389_s15 }
  0x55   : > { %s3391_s8 = scalar_lea.vmem %s3390_s15, 32  ;;  %p3392_p12 = scmp.lt.s32.totalorder %s3802_s18, %s3390_s15 }
  0x56   : > { %p3387_p11 = pnand %p3385_p10, %p3817_p1  ;;  %p3393_p3 = scmp.lt.s32.totalorder %s3391_s8, %s3384_s28 }
  0x58   : > { %p3388_p4 = pneg %p3387_p11  ;;  %p3394_p9 = por %p3393_p3, %p3392_p12 }
  0x5a   : > { %p3395_p0 = pnand %p3394_p9, %p3388_p4 }
  0x5c   : > { %3398 = shalt.err (!%p3395_p0)
}
  0x5d   : > { %3075 = dma.hbm_to_vmem [thread:$0]  (!%p3783_p8), %s3799_s14, 16, %s3802_s18, %s3811_s12  }
  0x5e   : > { %s3619_s10 = smov [#allocation14]   ;;  %s2770_s20 = sshll.u32 %s3751_s16, 1 }
  0x5f   : > { %s259_s4 = sshll.u32 %s3619_s10, 4  ;;  %s3399_s15 = scalar_lea.hbm %s5068_s5, 64  ;;  %s260_s4 = int_to_ptr.vmem [resolvable:$true] %s259_s4 }
  0x60   : > { %p3400_p3 = scmp.ne.s32.totalorder %s5068_s5, %s3399_s15  ;;  %p5134_p12 = scmp.ne.s32.totalorder %s5120_s13, 0 }
  0x61   : > { %p3406_p5 = scmp.lt.u32.totalorder %s3399_s15, %s5068_s5 }
  0x62   : > { %p5135_p6 = pneg %p5134_p12 }
  0x64   : > { %p3402_p13 = pnand %p3400_p3, %p5135_p6 }
  0x66   : > { %p3403_p2 = pneg %p3402_p13 }
  0x68   : > { %p3408_p7 = pnand %p3406_p5, %p3403_p2 }
  0x6a   : > { %3411 = shalt.err (!%p3408_p7)
}
  0x6b   : > { %s3412_s14 = scalar_lea.vmem %s260_s4, 64  ;;  %p5136_p11 = pmov %p5135_p6 }
  0x6c   : > { %p3413_p10 = scmp.ne.s32.totalorder %s260_s4, %s3412_s14  ;;  %p3420_p0 = scmp.lt.s32.totalorder %s260_s4, %s260_s4 }
  0x6d   : > { %p3421_p8 = scmp.lt.s32.totalorder %s3412_s14, %s3412_s14 }
  0x6e   : > { %p3415_p4 = pnand %p3413_p10, %p5136_p11 }
  0x6f   : > { %p3422_p1 = por %p3421_p8, %p3420_p0 }
  0x70   : > { %p3416_p9 = pneg %p3415_p4 }
  0x72   : > { %p3423_p3 = pnand %p3422_p1, %p3416_p9 }
  0x74   : > { %3426 = shalt.err (!%p3423_p3)
}
  0x75   : > { %3068 = dma.hbm_to_vmem [thread:$0]  (!%p5134_p12), %s5068_s5, 64, %s260_s4, [#allocation15]  }
  0x76   : > { %s2855_s21 = sshll.u32 %s3611_s25, 5  ;;  %s274_s15 = scalar_lea.vmem [#allocation5], %s2770_s20 }
  0x77   : > { %s3866_s11 = scalar_lea.hbm %s5063_s0, %s2855_s21  ;;  %s284_s28 = sshll.u32 %s274_s15, 4  ;;  %s285_s28 = int_to_ptr.vmem [resolvable:$true] %s284_s28 }
  0x78   : > { %s271_s13 = scalar_lea.sflag [#allocation6], %s3751_s16  ;;  %s3427_s8 = scalar_lea.hbm %s3866_s11, 32 }
  0x79   : > { %p3428_p8 = scmp.ne.s32.totalorder %s3866_s11, %s3427_s8  ;;  %p5137_p1 = scmp.ne.s32.totalorder %s5133_s17, 0 }
  0x7a   : > { %s3432_s1 = scalar_lea.hbm %s5063_s0, 64  ;;  %p3433_p12 = scmp.lt.u32.totalorder %s3866_s11, %s5063_s0 }
  0x7b   : > { %p3430_p6 = pnand %p3428_p8, %p5137_p1  ;;  %p3434_p2 = scmp.lt.u32.totalorder %s3432_s1, %s3427_s8 }
  0x7c   : > { %p3436_p7 = scmp.lt.u32.totalorder %s3427_s8, %s3866_s11 }
  0x7d   : > { %p3431_p13 = pneg %p3430_p6  ;;  %p3435_p5 = por %p3434_p2, %p3433_p12 }
  0x7f   : > { %p3437_p10 = por %p3436_p7, %p3435_p5 }
  0x81   : > { %p3438_p11 = pnand %p3437_p10, %p3431_p13 }
  0x83   : > { %3441 = shalt.err (!%p3438_p11)
}
  0x84   : > { %s3442_s20 = scalar_lea.vmem %s285_s28, 32  ;;  %s3620_s23 = smov [#allocation5]  }
  0x85   : > { %p3443_p4 = scmp.ne.s32.totalorder %s285_s28, %s3442_s20  ;;  %s3447_s10 = sshll.u32 %s3620_s23, 4  ;;  %s3448_s10 = int_to_ptr.vmem [resolvable:$false] %s3447_s10 }
  0x86   : > { %s3449_s15 = scalar_lea.vmem %s3448_s10, 64  ;;  %p3450_p3 = scmp.lt.s32.totalorder %s285_s28, %s3448_s10 }
  0x87   : > { %p3445_p9 = pnand %p3443_p4, %p5137_p1  ;;  %p3451_p8 = scmp.lt.s32.totalorder %s3449_s15, %s3442_s20 }
  0x89   : > { %p3446_p0 = pneg %p3445_p9  ;;  %p3452_p6 = por %p3451_p8, %p3450_p3 }
  0x8b   : > { %p3453_p2 = pnand %p3452_p6, %p3446_p0 }
  0x8d   : > { %3456 = shalt.err (!%p3453_p2)
}
  0x8e   : > { %p5138_p12 = scmp.ne.s32.totalorder %s5128_s29, 0  ;;  %s312_s8 = scalar_lea.vmem [#allocation10], %s3751_s16 }
  0x8f   : > { %s320_s4 = sshll.u32 %s312_s8, 4  ;;  %s2775_s14 = sshll.u32 %s3751_s16, 3  ;;  %s321_s4 = int_to_ptr.vmem [resolvable:$true] %s320_s4 }
  0x90   : > { %3072 = dma.hbm_to_vmem [thread:$0]  (!%p5138_p12), %s3866_s11, 32, %s285_s28, %s271_s13  }
  0x91   : > { %s3457_s1 = scalar_lea.hbm %s3807_s19, 16  ;;  %s3462_s20 = scalar_lea.hbm %s5065_s2, 32 }
  0x92   : > { %p3458_p13 = scmp.ne.s32.totalorder %s3807_s19, %s3457_s1  ;;  %p3463_p10 = scmp.lt.u32.totalorder %s3807_s19, %s5065_s2 }
  0x93   : > { %p3464_p11 = scmp.lt.u32.totalorder %s3462_s20, %s3457_s1  ;;  %p3466_p9 = scmp.lt.u32.totalorder %s3457_s1, %s3807_s19 }
  0x94   : > { %p3460_p5 = pnand %p3458_p13, %p5137_p1 }
  0x95   : > { %p3465_p4 = por %p3464_p11, %p3463_p10 }
  0x96   : > { %p3461_p7 = pneg %p3460_p5 }
  0x97   : > { %p3467_p0 = por %p3466_p9, %p3465_p4 }
  0x99   : > { %p3468_p3 = pnand %p3467_p0, %p3461_p7 }
  0x9b   : > { %3471 = shalt.err (!%p3468_p3)
}
  0x9c   : > { %s3472_s11 = scalar_lea.vmem %s321_s4, 16  ;;  %s3621_s28 = smov [#allocation10]  }
  0x9d   : > { %p3473_p8 = scmp.ne.s32.totalorder %s321_s4, %s3472_s11  ;;  %s3477_s13 = sshll.u32 %s3621_s28, 4  ;;  %s3478_s13 = int_to_ptr.vmem [resolvable:$false] %s3477_s13 }
  0x9e   : > { %s3479_s15 = scalar_lea.vmem %s3478_s13, 32  ;;  %p3480_p13 = scmp.lt.s32.totalorder %s321_s4, %s3478_s13 }
  0x9f   : > { %p3475_p6 = pnand %p3473_p8, %p5137_p1  ;;  %p3481_p5 = scmp.lt.s32.totalorder %s3479_s15, %s3472_s11 }
  0xa1   : > { %p3476_p2 = pneg %p3475_p6  ;;  %p3482_p12 = por %p3481_p5, %p3480_p13 }
  0xa3   : > { %p3483_p10 = pnand %p3482_p12, %p3476_p2 }
  0xa5   : > { %3486 = shalt.err (!%p3483_p10)
}
  0xa6   : > { %p5139_p11 = scmp.ne.s32.totalorder %s5128_s29, 0  ;;  %s2856_s8 = sshll.u32 %s3611_s25, 7 }
  0xa7   : > { %s331_s1 = scalar_lea.vmem [#allocation11], %s2775_s14  ;;  %s3912_s23 = scalar_lea.hbm %s5066_s3, %s2856_s8 }
  0xa8   : > { %3078 = dma.hbm_to_vmem [thread:$0]  (!%p5139_p11), %s3807_s19, 16, %s321_s4, %s3811_s12  }
  0xa9   : > { %s341_s18 = sshll.u32 %s331_s1, 4  ;;  %s5140_s10 = sand.u32 1, %s3615_s26   ;;  %s342_s18 = int_to_ptr.vmem [resolvable:$true] %s341_s18 }
  0xaa   : > { %s328_s11 = scalar_lea.sflag [#allocation12], %s5140_s10  ;;  %s3487_s28 = scalar_lea.hbm %s3912_s23, 128 }
  0xab   : > { %p3488_p12 = scmp.ne.s32.totalorder %s3912_s23, %s3487_s28  ;;  %s3492_s19 = scalar_lea.hbm %s5066_s3, 256 }
  0xac   : > { %p3493_p9 = scmp.lt.u32.totalorder %s3912_s23, %s5066_s3  ;;  %p3494_p0 = scmp.lt.u32.totalorder %s3492_s19, %s3487_s28 }
  0xad   : > { %p3490_p7 = pnand %p3488_p12, %p5137_p1  ;;  %p3496_p8 = scmp.lt.u32.totalorder %s3487_s28, %s3912_s23 }
  0xae   : > { %p3495_p3 = por %p3494_p0, %p3493_p9 }
  0xaf   : > { %p3491_p4 = pneg %p3490_p7 }
  0xb0   : > { %p3497_p6 = por %p3496_p8, %p3495_p3 }
  0xb2   : > { %p3498_p2 = pnand %p3497_p6, %p3491_p4 }
  0xb4   : > { %3501 = shalt.err (!%p3498_p2)
}
  0xb5   : > { %s3502_s13 = scalar_lea.vmem %s342_s18, 128  ;;  %s3622_s15 = smov [#allocation11]  }
  0xb6   : > { %p3503_p13 = scmp.ne.s32.totalorder %s342_s18, %s3502_s13  ;;  %s3507_s8 = sshll.u32 %s3622_s15, 4  ;;  %s3508_s8 = int_to_ptr.vmem [resolvable:$false] %s3507_s8 }
  0xb7   : > { %s3509_s1 = scalar_lea.vmem %s3508_s8, 256  ;;  %p3510_p12 = scmp.lt.s32.totalorder %s342_s18, %s3508_s8 }
  0xb8   : > { %p3505_p5 = pnand %p3503_p13, %p5137_p1  ;;  %p3511_p7 = scmp.lt.s32.totalorder %s3509_s1, %s3502_s13 }
  0xba   : > { %p3506_p10 = pneg %p3505_p5  ;;  %p3512_p11 = por %p3511_p7, %p3510_p12 }
  0xbc   : > { %p3513_p0 = pnand %p3512_p11, %p3506_p10 }
  0xbe   : > { %3516 = shalt.err (!%p3513_p0)
}
  0xbf   : > { %p5141_p9 = scmp.ne.s32.totalorder %s5128_s29, 0  ;;  %p5142_p4 = scmp.ne.s32.totalorder %s5119_s9, 0 }
  0xc1   : > { %3081 = dma.hbm_to_vmem [thread:$0]  (!%p5141_p9), %s3912_s23, 128, %s342_s18, %s328_s11  }
  0xc2   : > { %350 = sbr.rel (%p5142_p4) target bundleno = 1536 (0x600), region = 44 }
  0xc9   : > { %s3936_s17 = sand.u32 1, %s3599_s22   ;;  %p5143_p1 = scmp.ne.s32.totalorder %s5115_s30, 0 }
  0xca   : > { %s2779_s21 = sshll.u32 %s3936_s17, 1  ;;  %s353_s20 = scalar_lea.sflag [#allocation6], %s3936_s17 }
  0xcb   : > { %s356_s10 = scalar_lea.vmem [#allocation5], %s2779_s21 }
  0xcc   : > { %3570 = dma.done.wait (%p5143_p1), %s353_s20, 32  }
  0xcd   : > { %3572 = vsyncadd (%p5143_p1), %s353_s20, 4294967264  ;;  %s361_s29 = sand.u32 1, %s3694_s27   ;;  %s364_s18 = scalar_lea.vmem [#allocation8], %s3936_s17 }
  0xce   : > { %s362_s9 = scalar_lea.sflag [#allocation9], %s361_s29 }
  0xcf   : > { %3574 = dma.done.wait (%p5143_p1), %s362_s9, 32  }
  0xd0   : > { %3576 = vsyncadd (%p5143_p1), %s362_s9, 4294967264  ;;  %s2780_s23 = sshll.u32 %s3936_s17, 3  ;;  %s372_s11 = scalar_lea.vmem [#allocation10], %s3936_s17 }
  0xd1   : > { %s378_s28 = scalar_lea.sflag [#allocation12], %s361_s29  ;;  %s3954_s12 = scalar_lea.vmem [#allocation11], %s2780_s23 }
  0xd2   : > { %3578 = dma.done.wait (%p5143_p1), %s378_s28, 128  }
  0xd3   : > { %3580 = vsyncadd (%p5143_p1), %s378_s28, 4294967168  ;;  %p5144_p11 = scmp.eq.s32.totalorder %s3694_s27, 0 }
  0xd5   : > { %3582 = dma.done.wait (%p5144_p11), [#allocation12], 64   ;;  %p5145_p3 = pmov %p5144_p11 }
  0xd7   : > { %3584 = vsyncadd (%p5145_p3), [#allocation12], 4294967232  ;;  %p5146_p8 = pmov %p5145_p3 }
  0xd8   : > { %p5147_p6 = pmov %p5145_p3 }
  0xd9   : > { %3586 = dma.done.wait (%p5146_p8), [#allocation15], 64  }
  0xda   : > { %3588 = vsyncadd (%p5147_p6), [#allocation15], 4294967232  ;;  %v551_v0 = vlaneseq  ;;  %v3623_v1 = vmov 1966171168   ;;  %vm645_vm0 = vcmask 1040384   ;;  %vm504_vm1 = vcmask 15360  }
  0xdb   : > { %v549_v2 = vunpack.c.l.s4 %v3623_v1  ;;  %v2784_v6 = vld.sshfl [vmem:[%s356_s10] sm:$0x11 pattern:$0x75316420]  ;;  %vm439_vm2 = vcmask 7168   ;;  %v3624_v28 = vmov -inf   ;;  %vm4948_vm4 = vmpackc.low %vm504_vm1, %vm504_vm1 }
  0xdc   : > { %v552_v3 = vshrl.u32 %v551_v0, 7  ;;  %v538_v7 = vld [vmem:[%s364_s18] sm:$0x1]  ;;  %v547_v10 = vcombine.high %v2784_v6, %v2784_v6  ;;  %442 = vst.msk [vmem:[#allocation2 + $0x10] sm:$0xff] %vm439_vm2, %v3624_v28  ;;  %440 = vst.msk [vmem:[#allocation2] sm:$0xff] %vm439_vm2, %v3624_v28  ;;  %vm842_vm3 = vcmask 523264  }
  0xdd   : > { %v550_v4 = vunpack.c.0.s8 %v549_v2  ;;  %3042 = vmatprep.subr.msk.bf16.mxu0 %vm645_vm0, %v538_v7  ;;  %v647_v9 = vsel %vm645_vm0, %v538_v7, 0  ;;  %441 = vst.msk [vmem:[#allocation2 + $0x8] sm:$0xff] %vm439_vm2, %v3624_v28  ;;  %443 = vst.msk [vmem:[#allocation2 + $0x18] sm:$0xff] %vm439_vm2, %v3624_v28  ;;  %v3625_v44 = vmov 0   ;;  %v3626_v52 = vmov 0.0   ;;  %s2857_s27 = sshll.u32 %s3607_s24, 7 }
  0xde   : > { %2927 = vmatpush3.bf16.msra.mxu0 %v647_v9  ;;  %444 = vst.msk [vmem:[#allocation2 + $0x20] sm:$0xff] %vm439_vm2, %v3624_v28  ;;  %445 = vst.msk [vmem:[#allocation2 + $0x28] sm:$0xff] %vm439_vm2, %v3624_v28  ;;  %3146 = vset.pattern.permute.xlu1 %v3625_v44  ;;  %s430_s30 = scalar_lea.vmem [#allocation16], %s2780_s23  ;;  %s5014_s14 = scalar_lea.hbm %s5069_s6, %s2857_s27 }
  0xdf   : > { %v553_v5 = vsub.s32 %v550_v4, %v552_v3  ;;  %446 = vst.msk [vmem:[#allocation2 + $0x30] sm:$0xff] %vm439_vm2, %v3624_v28  ;;  %447 = vst.msk [vmem:[#allocation2 + $0x38] sm:$0xff] %vm439_vm2, %v3624_v28  ;;  %s2593_s16 = sshll.u32 %s430_s30, 4  ;;  %s2577_s13 = scalar_lea.sflag [#allocation7], %s3936_s17  ;;  %s5016_s16 = int_to_ptr.vmem [resolvable:$true] %s2593_s16 }
  0xe0   : > { %448 = vst.msk [vmem:[#allocation2 + $0x40] sm:$0xff] %vm439_vm2, %v3624_v28  ;;  %449 = vst.msk [vmem:[#allocation2 + $0x48] sm:$0xff] %vm439_vm2, %v3624_v28  ;;  %s3517_s15 = scalar_lea.vmem %s5016_s16, 128  ;;  %p5219_p13 = scmp.ne.s32.totalorder %s5116_s7, 0 }
  0xe1   : > { %v554_v8 = vrot.slane %v2784_v6, %v553_v5  ;;  %v561_v11 = vrot.slane %v547_v10, %v553_v5  ;;  %450 = vst.msk [vmem:[#allocation2 + $0x50] sm:$0xff] %vm439_vm2, %v3624_v28  ;;  %451 = vst.msk [vmem:[#allocation2 + $0x58] sm:$0xff] %vm439_vm2, %v3624_v28  ;;  %p3518_p2 = scmp.ne.s32.totalorder %s5016_s16, %s3517_s15  ;;  %s3627_s24 = smov [#allocation16]  }
  0xe2   : > { %452 = vst.msk [vmem:[#allocation2 + $0x60] sm:$0xff] %vm439_vm2, %v3624_v28  ;;  %453 = vst.msk [vmem:[#allocation2 + $0x68] sm:$0xff] %vm439_vm2, %v3624_v28  ;;  %s3521_s8 = sshll.u32 %s3627_s24, 4  ;;  %s3522_s8 = int_to_ptr.vmem [resolvable:$false] %s3521_s8 }
  0xe3   : > { %564 = vxpose.xlu0.c.b16.start.end [1/1] (short) %v554_v8, 128  ;;  %454 = vst.msk [vmem:[#allocation2 + $0x70] sm:$0xff] %vm439_vm2, %v3624_v28  ;;  %455 = vst.msk [vmem:[#allocation2 + $0x78] sm:$0xff] %vm439_vm2, %v3624_v28  ;;  %p3519_p5 = pnand %p3518_p2, %p5219_p13  ;;  %s3523_s1 = scalar_lea.vmem %s3522_s8, 256 }
  0xe4   : > { %456 = vst.msk [vmem:[#allocation2 + $0x80] sm:$0xff] %vm439_vm2, %v3624_v28  ;;  %457 = vst.msk [vmem:[#allocation2 + $0x88] sm:$0xff] %vm439_vm2, %v3624_v28  ;;  %p3524_p12 = scmp.lt.s32.totalorder %s5016_s16, %s3522_s8  ;;  %p3525_p7 = scmp.lt.s32.totalorder %s3523_s1, %s3517_s15 }
  0xe5   : > { %458 = vst.msk [vmem:[#allocation2 + $0x90] sm:$0xff] %vm439_vm2, %v3624_v28  ;;  %459 = vst.msk [vmem:[#allocation2 + $0x98] sm:$0xff] %vm439_vm2, %v3624_v28  ;;  %p3520_p10 = pneg %p3519_p5 }
  0xe6   : > { %460 = vst.msk [vmem:[#allocation2 + $0xa0] sm:$0xff] %vm439_vm2, %v3624_v28  ;;  %461 = vst.msk [vmem:[#allocation2 + $0xa8] sm:$0xff] %vm439_vm2, %v3624_v28  ;;  %p3526_p0 = por %p3525_p7, %p3524_p12 }
  0xe7   : > { %462 = vst.msk [vmem:[#allocation2 + $0xb0] sm:$0xff] %vm439_vm2, %v3624_v28  ;;  %463 = vst.msk [vmem:[#allocation2 + $0xb8] sm:$0xff] %vm439_vm2, %v3624_v28 }
  0xe8   : > { %464 = vst.msk [vmem:[#allocation2 + $0xc0] sm:$0xff] %vm439_vm2, %v3624_v28  ;;  %465 = vst.msk [vmem:[#allocation2 + $0xc8] sm:$0xff] %vm439_vm2, %v3624_v28  ;;  %p3527_p9 = pnand %p3526_p0, %p3520_p10 }
  0xe9   : > { %466 = vst.msk [vmem:[#allocation2 + $0xd0] sm:$0xff] %vm439_vm2, %v3624_v28  ;;  %467 = vst.msk [vmem:[#allocation2 + $0xd8] sm:$0xff] %vm439_vm2, %v3624_v28 }
  0xea   : > { %468 = vst.msk [vmem:[#allocation2 + $0xe0] sm:$0xff] %vm439_vm2, %v3624_v28  ;;  %469 = vst.msk [vmem:[#allocation2 + $0xe8] sm:$0xff] %vm439_vm2, %v3624_v28 }
  0xeb   : > { %470 = vst.msk [vmem:[#allocation2 + $0xf0] sm:$0xff] %vm439_vm2, %v3624_v28  ;;  %471 = vst.msk [vmem:[#allocation2 + $0xf8] sm:$0xff] %vm439_vm2, %v3624_v28 }
  0xec   : > { %505 = vst.msk [vmem:[#allocation4] sm:$0xff] %vm504_vm1, %v3626_v52  ;;  %506 = vst.msk [vmem:[#allocation4 + $0x8] sm:$0xff] %vm504_vm1, %v3626_v52 }
  0xed   : > { %472 = vst.msk [vmem:[#allocation3] sm:$0xff] %vm439_vm2, %v3626_v52  ;;  %473 = vst.msk [vmem:[#allocation3 + $0x8] sm:$0xff] %vm439_vm2, %v3626_v52 }
  0xee   : > { %474 = vst.msk [vmem:[#allocation3 + $0x10] sm:$0xff] %vm439_vm2, %v3626_v52  ;;  %475 = vst.msk [vmem:[#allocation3 + $0x18] sm:$0xff] %vm439_vm2, %v3626_v52 }
  0xef   : > { %476 = vst.msk [vmem:[#allocation3 + $0x20] sm:$0xff] %vm439_vm2, %v3626_v52  ;;  %477 = vst.msk [vmem:[#allocation3 + $0x28] sm:$0xff] %vm439_vm2, %v3626_v52 }
  0xf0   : > { %478 = vst.msk [vmem:[#allocation3 + $0x30] sm:$0xff] %vm439_vm2, %v3626_v52  ;;  %479 = vst.msk [vmem:[#allocation3 + $0x38] sm:$0xff] %vm439_vm2, %v3626_v52 }
  0xf1   : > { %480 = vst.msk [vmem:[#allocation3 + $0x40] sm:$0xff] %vm439_vm2, %v3626_v52  ;;  %481 = vst.msk [vmem:[#allocation3 + $0x48] sm:$0xff] %vm439_vm2, %v3626_v52 }
  0xf2   : > { %482 = vst.msk [vmem:[#allocation3 + $0x50] sm:$0xff] %vm439_vm2, %v3626_v52  ;;  %483 = vst.msk [vmem:[#allocation3 + $0x58] sm:$0xff] %vm439_vm2, %v3626_v52 }
  0xf3   : > { %484 = vst.msk [vmem:[#allocation3 + $0x60] sm:$0xff] %vm439_vm2, %v3626_v52  ;;  %485 = vst.msk [vmem:[#allocation3 + $0x68] sm:$0xff] %vm439_vm2, %v3626_v52 }
  0xf4   : > { %486 = vst.msk [vmem:[#allocation3 + $0x70] sm:$0xff] %vm439_vm2, %v3626_v52  ;;  %487 = vst.msk [vmem:[#allocation3 + $0x78] sm:$0xff] %vm439_vm2, %v3626_v52 }
  0xf5   : > { %488 = vst.msk [vmem:[#allocation3 + $0x80] sm:$0xff] %vm439_vm2, %v3626_v52  ;;  %489 = vst.msk [vmem:[#allocation3 + $0x88] sm:$0xff] %vm439_vm2, %v3626_v52 }
  0xf6   : > { %490 = vst.msk [vmem:[#allocation3 + $0x90] sm:$0xff] %vm439_vm2, %v3626_v52  ;;  %491 = vst.msk [vmem:[#allocation3 + $0x98] sm:$0xff] %vm439_vm2, %v3626_v52 }
  0xf7   : > { %492 = vst.msk [vmem:[#allocation3 + $0xa0] sm:$0xff] %vm439_vm2, %v3626_v52  ;;  %493 = vst.msk [vmem:[#allocation3 + $0xa8] sm:$0xff] %vm439_vm2, %v3626_v52 }
  0xf8   : > { %494 = vst.msk [vmem:[#allocation3 + $0xb0] sm:$0xff] %vm439_vm2, %v3626_v52  ;;  %495 = vst.msk [vmem:[#allocation3 + $0xb8] sm:$0xff] %vm439_vm2, %v3626_v52 }
  0xf9   : > { %496 = vst.msk [vmem:[#allocation3 + $0xc0] sm:$0xff] %vm439_vm2, %v3626_v52  ;;  %497 = vst.msk [vmem:[#allocation3 + $0xc8] sm:$0xff] %vm439_vm2, %v3626_v52 }
  0xfa   : > { %498 = vst.msk [vmem:[#allocation3 + $0xd0] sm:$0xff] %vm439_vm2, %v3626_v52  ;;  %499 = vst.msk [vmem:[#allocation3 + $0xd8] sm:$0xff] %vm439_vm2, %v3626_v52 }
  0xfb   : > { %500 = vst.msk [vmem:[#allocation3 + $0xe0] sm:$0xff] %vm439_vm2, %v3626_v52  ;;  %501 = vst.msk [vmem:[#allocation3 + $0xe8] sm:$0xff] %vm439_vm2, %v3626_v52 }
  0xfc   : > { %502 = vst.msk [vmem:[#allocation3 + $0xf0] sm:$0xff] %vm439_vm2, %v3626_v52  ;;  %503 = vst.msk [vmem:[#allocation3 + $0xf8] sm:$0xff] %vm439_vm2, %v3626_v52 }
  0xfd   : > { %507 = vst.msk [vmem:[#allocation4 + $0x10] sm:$0xff] %vm504_vm1, %v3626_v52  ;;  %508 = vst.msk [vmem:[#allocation4 + $0x18] sm:$0xff] %vm504_vm1, %v3626_v52 }
  0xfe   : > { %509 = vst.msk [vmem:[#allocation4 + $0x20] sm:$0xff] %vm504_vm1, %v3626_v52  ;;  %510 = vst.msk [vmem:[#allocation4 + $0x28] sm:$0xff] %vm504_vm1, %v3626_v52 }
  0xff   : > { %511 = vst.msk [vmem:[#allocation4 + $0x30] sm:$0xff] %vm504_vm1, %v3626_v52  ;;  %512 = vst.msk [vmem:[#allocation4 + $0x38] sm:$0xff] %vm504_vm1, %v3626_v52 }
 0x100   : > { %580 = vxpose.xlu0.c.b16.start.end [1/1] (short) %v561_v11, 128  ;;  %513 = vst.msk [vmem:[#allocation4 + $0x40] sm:$0xff] %vm504_vm1, %v3626_v52  ;;  %514 = vst.msk [vmem:[#allocation4 + $0x48] sm:$0xff] %vm504_vm1, %v3626_v52 }
 0x101   : > { %515 = vst.msk [vmem:[#allocation4 + $0x50] sm:$0xff] %vm504_vm1, %v3626_v52  ;;  %516 = vst.msk [vmem:[#allocation4 + $0x58] sm:$0xff] %vm504_vm1, %v3626_v52 }
 0x102   : > { %517 = vst.msk [vmem:[#allocation4 + $0x60] sm:$0xff] %vm504_vm1, %v3626_v52  ;;  %518 = vst.msk [vmem:[#allocation4 + $0x68] sm:$0xff] %vm504_vm1, %v3626_v52 }
 0x103   : > { %519 = vst.msk [vmem:[#allocation4 + $0x70] sm:$0xff] %vm504_vm1, %v3626_v52  ;;  %520 = vst.msk [vmem:[#allocation4 + $0x78] sm:$0xff] %vm504_vm1, %v3626_v52 }
 0x104   : > { %521 = vst.msk [vmem:[#allocation4 + $0x80] sm:$0xff] %vm504_vm1, %v3626_v52  ;;  %522 = vst.msk [vmem:[#allocation4 + $0x88] sm:$0xff] %vm504_vm1, %v3626_v52 }
 0x105   : > { %523 = vst.msk [vmem:[#allocation4 + $0x90] sm:$0xff] %vm504_vm1, %v3626_v52  ;;  %524 = vst.msk [vmem:[#allocation4 + $0x98] sm:$0xff] %vm504_vm1, %v3626_v52 }
 0x106   : > { %525 = vst.msk [vmem:[#allocation4 + $0xa0] sm:$0xff] %vm504_vm1, %v3626_v52  ;;  %526 = vst.msk [vmem:[#allocation4 + $0xa8] sm:$0xff] %vm504_vm1, %v3626_v52 }
 0x107   : > { %527 = vst.msk [vmem:[#allocation4 + $0xb0] sm:$0xff] %vm504_vm1, %v3626_v52  ;;  %528 = vst.msk [vmem:[#allocation4 + $0xb8] sm:$0xff] %vm504_vm1, %v3626_v52 }
 0x108   : > { %529 = vst.msk [vmem:[#allocation4 + $0xc0] sm:$0xff] %vm504_vm1, %v3626_v52  ;;  %530 = vst.msk [vmem:[#allocation4 + $0xc8] sm:$0xff] %vm504_vm1, %v3626_v52 }
 0x109   : > { %3147 = vset.pattern.permute.xlu0 %v3625_v44  ;;  %531 = vst.msk [vmem:[#allocation4 + $0xd0] sm:$0xff] %vm504_vm1, %v3626_v52  ;;  %532 = vst.msk [vmem:[#allocation4 + $0xd8] sm:$0xff] %vm504_vm1, %v3626_v52  ;;  %v810_v44 = vld [vmem:[#allocation2] sm:$0xff] }
 0x10a   : > { %533 = vst.msk [vmem:[#allocation4 + $0xe0] sm:$0xff] %vm504_vm1, %v3626_v52  ;;  %534 = vst.msk [vmem:[#allocation4 + $0xe8] sm:$0xff] %vm504_vm1, %v3626_v52 }
 0x10b   : > { %535 = vst.msk [vmem:[#allocation4 + $0xf0] sm:$0xff] %vm504_vm1, %v3626_v52  ;;  %536 = vst.msk [vmem:[#allocation4 + $0xf8] sm:$0xff] %vm504_vm1, %v3626_v52 }
 0x149   : > { %v572_v12 = vpop.trf.xlu0 }
 0x14a   : > { %2928 = vmatprep.mubr.msk.bf16.mxu0 %vm504_vm1, %v572_v12 }
 0x14d   : > { %v573_v13 = vpop.trf.xlu0 }
 0x14e   : > { %2929 = vmatmul.mubr.msk.bf16.vlgmr.msra.gmra.mrb[0].mxu0 %vm504_vm1, %v573_v13 }
 0x151   : > { %v574_v14 = vpop.trf.xlu0 }
 0x152   : > { %2932 = vmatprep.mubr.msk.bf16.mxu0 %vm504_vm1, %v574_v14 }
 0x155   : > { %v575_v15 = vpop.trf.xlu0 }
 0x156   : > { %2933 = vmatmul.mubr.msk.bf16.gmra.mrb[4].mxu0 %vm504_vm1, %v575_v15 }
 0x159   : > { %v576_v16 = vpop.trf.xlu0 }
 0x15a   : > { %2936 = vmatprep.mubr.msk.bf16.mxu0 %vm504_vm1, %v576_v16 }
 0x15d   : > { %v577_v17 = vpop.trf.xlu0 }
 0x15e   : > { %2937 = vmatmul.mubr.msk.bf16.gmra.mrb[8].mxu0 %vm504_vm1, %v577_v17 }
 0x161   : > { %v578_v18 = vpop.trf.xlu0 }
 0x162   : > { %2940 = vmatprep.mubr.msk.bf16.mxu0 %vm504_vm1, %v578_v18 }
 0x165   : > { %v579_v19 = vpop.trf.xlu0 }
 0x166   : > { %2941 = vmatmul.mubr.msk.bf16.gmra.mrb[12].mxu0 %vm504_vm1, %v579_v19 }
 0x169   : > { %v588_v20 = vpop.trf.xlu0 }
 0x16a   : > { %2944 = vmatprep.mubr.msk.bf16.mxu0 %vm504_vm1, %v588_v20 }
 0x16d   : > { %v589_v21 = vpop.trf.xlu0 }
 0x16e   : > { %2945 = vmatmul.mubr.msk.bf16.gmra.mrb[16].mxu0 %vm504_vm1, %v589_v21 }
 0x171   : > { %v590_v22 = vpop.trf.xlu0 }
 0x172   : > { %2948 = vmatprep.mubr.msk.bf16.mxu0 %vm504_vm1, %v590_v22 }
 0x175   : > { %v591_v23 = vpop.trf.xlu0 }
 0x176   : > { %2949 = vmatmul.mubr.msk.bf16.gmra.mrb[20].mxu0 %vm504_vm1, %v591_v23 }
 0x179   : > { %v592_v24 = vpop.trf.xlu0 }
 0x17a   : > { %2952 = vmatprep.mubr.msk.bf16.mxu0 %vm504_vm1, %v592_v24 }
 0x17d   : > { %v593_v25 = vpop.trf.xlu0 }
 0x17e   : > { %2953 = vmatmul.mubr.msk.bf16.gmra.mrb[24].mxu0 %vm504_vm1, %v593_v25 }
 0x181   : > { %v594_v26 = vpop.trf.xlu0 }
 0x182   : > { %2956 = vmatprep.mubr.msk.bf16.mxu0 %vm504_vm1, %v594_v26 }
 0x185   : > { %v595_v27 = vpop.trf.xlu0 }
 0x186   : > { %2957 = vmatmul.mubr.msk.bf16.gmra.mrb[28].mxu0 %vm504_vm1, %v595_v27 }
 0x221   : > { %v4016_v29 = vpop.f32.mrb[0].mxu0 }
 0x222   : > { %v4018_v30 = vpop.f32.mrb[1].mxu0  ;;  %v849_v31 = vsel %vm842_vm3, %v4016_v29, -inf }
 0x223   : > { %850 = vmax.xlane.f32.xlu1 %v849_v31  ;;  %v4022_v32 = vpop.f32.mrb[2].mxu0  ;;  %v843_v34 = vsel %vm842_vm3, %v4018_v30, -inf }
 0x224   : > { %v4024_v33 = vpop.f32.mrb[3].mxu0  ;;  %v852_v36 = vsel %vm842_vm3, %v4022_v32, -inf }
 0x225   : > { %v846_v40 = vsel %vm842_vm3, %v4024_v33, -inf }
 0x227   : > { %844 = vmax.xlane.f32.xlu1 %v843_v34 }
 0x229   : > { %v4028_v35 = vpop.f32.mrb[4].mxu0 }
 0x22a   : > { %v4032_v37 = vpop.f32.mrb[5].mxu0  ;;  %v861_v41 = vsel %vm842_vm3, %v4028_v35, -inf }
 0x22b   : > { %853 = vmax.xlane.f32.xlu1 %v852_v36  ;;  %v4034_v38 = vpop.f32.mrb[6].mxu0  ;;  %v855_v48 = vsel %vm842_vm3, %v4032_v37, -inf  ;;  %v4275_v36 = vld [vmem:[#allocation2 + $0x10] sm:$0xff] }
 0x22c   : > { %v4036_v39 = vpop.f32.mrb[7].mxu0  ;;  %v4058_v50 = vsel %vm842_vm3, %v4034_v38, -inf }
 0x22d   : > { %v858_v55 = vsel %vm842_vm3, %v4036_v39, -inf }
 0x22f   : > { %847 = vmax.xlane.f32.xlu1 %v846_v40 }
 0x231   : > { %v4042_v42 = vpop.f32.mrb[8].mxu0 }
 0x232   : > { %v4044_v43 = vpop.f32.mrb[9].mxu0  ;;  %v873_v61 = vsel %vm842_vm3, %v4042_v42, -inf }
 0x233   : > { %862 = vmax.xlane.f32.xlu1 %v861_v41  ;;  %v4046_v45 = vpop.f32.mrb[10].mxu0  ;;  %v867_v56 = vsel %vm842_vm3, %v4044_v43, -inf }
 0x234   : > { %v4048_v46 = vpop.f32.mrb[11].mxu0  ;;  %v876_v63 = vsel %vm842_vm3, %v4046_v45, -inf }
 0x235   : > { %v870_v47 = vsel %vm842_vm3, %v4048_v46, -inf }
 0x236   : > { %871 = vmax.xlane.f32.xlu0 %v870_v47 }
 0x237   : > { %856 = vmax.xlane.f32.xlu1 %v855_v48 }
 0x239   : > { %v4054_v49 = vpop.f32.mrb[12].mxu0 }
 0x23a   : > { %v4060_v51 = vpop.f32.mrb[13].mxu0  ;;  %v885_v3 = vsel %vm842_vm3, %v4054_v49, -inf }
 0x23b   : > { %865 = vmax.xlane.f32.xlu1 %v4058_v50  ;;  %v4191_v53 = vpop.f32.mrb[14].mxu0  ;;  %v879_v7 = vsel %vm842_vm3, %v4060_v51, -inf  ;;  %v4283_v50 = vld [vmem:[#allocation2 + $0x18] sm:$0xff] }
 0x23c   : > { %v4193_v54 = vpop.f32.mrb[15].mxu0  ;;  %v888_v13 = vsel %vm842_vm3, %v4191_v53, -inf }
 0x23d   : > { %v882_v15 = vsel %vm842_vm3, %v4193_v54, -inf }
 0x23f   : > { %859 = vmax.xlane.f32.xlu1 %v858_v55 }
 0x241   : > { %v4199_v57 = vpop.f32.mrb[16].mxu0 }
 0x242   : > { %v4201_v58 = vpop.f32.mrb[17].mxu0  ;;  %v897_v18 = vsel %vm842_vm3, %v4199_v57, -inf }
 0x243   : > { %868 = vmax.xlane.f32.xlu1 %v867_v56  ;;  %v4203_v59 = vpop.f32.mrb[18].mxu0  ;;  %v891_v21 = vsel %vm842_vm3, %v4201_v58, -inf  ;;  %v4289_v56 = vld [vmem:[#allocation2 + $0x8] sm:$0xff] }
 0x244   : > { %v4205_v60 = vpop.f32.mrb[19].mxu0  ;;  %v900_v22 = vsel %vm842_vm3, %v4203_v59, -inf }
 0x245   : > { %v894_v23 = vsel %vm842_vm3, %v4205_v60, -inf }
 0x247   : > { %874 = vmax.xlane.f32.xlu1 %v873_v61 }
 0x249   : > { %v4209_v62 = vpop.f32.mrb[20].mxu0 }
 0x24a   : > { %v909_v0 = vsel %vm842_vm3, %v4209_v62, -inf  ;;  %v4215_v1 = vpop.f32.mrb[21].mxu0 }
 0x24b   : > { %877 = vmax.xlane.f32.xlu1 %v876_v63  ;;  %910 = vmax.xlane.f32.xlu0 %v909_v0  ;;  %v4217_v2 = vpop.f32.mrb[22].mxu0  ;;  %v903_v5 = vsel %vm842_vm3, %v4215_v1, -inf  ;;  %v4297_v0 = vld [vmem:[#allocation2 + $0x30] sm:$0xff] }
 0x24c   : > { %v4221_v4 = vpop.f32.mrb[23].mxu0  ;;  %v912_v24 = vsel %vm842_vm3, %v4217_v2, -inf }
 0x24d   : > { %v906_v25 = vsel %vm842_vm3, %v4221_v4, -inf }
 0x24f   : > { %886 = vmax.xlane.f32.xlu1 %v885_v3  ;;  %904 = vmax.xlane.f32.xlu0 %v903_v5 }
 0x251   : > { %v4225_v6 = vpop.f32.mrb[24].mxu0 }
 0x252   : > { %v921_v8 = vsel %vm842_vm3, %v4225_v6, -inf  ;;  %v4231_v9 = vpop.f32.mrb[25].mxu0 }
 0x253   : > { %880 = vmax.xlane.f32.xlu1 %v879_v7  ;;  %922 = vmax.xlane.f32.xlu0 %v921_v8  ;;  %v4233_v10 = vpop.f32.mrb[26].mxu0  ;;  %v915_v11 = vsel %vm842_vm3, %v4231_v9, -inf  ;;  %v4305_v7 = vld [vmem:[#allocation2 + $0x48] sm:$0xff]  ;;  %v4307_v8 = vld [vmem:[#allocation2 + $0x20] sm:$0xff] }
 0x254   : > { %v4237_v12 = vpop.f32.mrb[27].mxu0  ;;  %v924_v26 = vsel %vm842_vm3, %v4233_v10, -inf }
 0x255   : > { %5148 = vst [vmem:[#allocation28_spill] sm:$0xff] %v4237_v12  ;;  %v918_v27 = vsel %vm842_vm3, %v4237_v12, -inf }
 0x257   : > { %889 = vmax.xlane.f32.xlu1 %v888_v13  ;;  %916 = vmax.xlane.f32.xlu0 %v915_v11  ;;  %v4384_v11 = vld [vmem:[#allocation2 + $0xa0] sm:$0xff] }
 0x259   : > { %v4241_v14 = vpop.f32.mrb[28].mxu0 }
 0x25a   : > { %5149 = vst [vmem:[#allocation29_spill] sm:$0xff] %v4241_v14  ;;  %v4245_v16 = vpop.f32.mrb[29].mxu0  ;;  %v933_v28 = vsel %vm842_vm3, %v4241_v14, -inf }
 0x25b   : > { %5150 = vst [vmem:[#allocation30_spill] sm:$0xff] %v4245_v16  ;;  %883 = vmax.xlane.f32.xlu1 %v882_v15  ;;  %v4247_v17 = vpop.f32.mrb[30].mxu0  ;;  %v927_v31 = vsel %vm842_vm3, %v4245_v16, -inf }
 0x25c   : > { %5151 = vst [vmem:[#allocation31_spill] sm:$0xff] %v4247_v17  ;;  %v4251_v19 = vpop.f32.mrb[31].mxu0  ;;  %v936_v34 = vsel %vm842_vm3, %v4247_v17, -inf }
 0x25d   : > { %5152 = vst [vmem:[#allocation32_spill] sm:$0xff] %v4251_v19  ;;  %v930_v20 = vsel %vm842_vm3, %v4251_v19, -inf }
 0x25e   : > { %931 = vmax.xlane.f32.xlu0 %v930_v20 }
 0x25f   : > { %898 = vmax.xlane.f32.xlu1 %v897_v18 }
 0x263   : > { %892 = vmax.xlane.f32.xlu1 %v891_v21  ;;  %v4320_v21 = vld [vmem:[#allocation2 + $0x38] sm:$0xff] }
 0x267   : > { %901 = vmax.xlane.f32.xlu1 %v900_v22  ;;  %v4382_v22 = vld [vmem:[#allocation2 + $0x70] sm:$0xff] }
 0x268   : > { %5158 = vst [vmem:[#allocation38_spill] sm:$0xff] %v4382_v22 }
 0x26b   : > { %895 = vmax.xlane.f32.xlu1 %v894_v23 }
 0x26f   : > { %913 = vmax.xlane.f32.xlu1 %v912_v24 }
 0x273   : > { %907 = vmax.xlane.f32.xlu1 %v906_v25 }
 0x277   : > { %925 = vmax.xlane.f32.xlu1 %v924_v26  ;;  %v1788_v26 = vld [vmem:[%s372_s11] sm:$0x1] }
 0x278   : > { %3043 = vmatprep.subr.msk.bf16.mxu1 %vm842_vm3, %v1788_v26 }
 0x27b   : > { %919 = vmax.xlane.f32.xlu1 %v918_v27 }
 0x27f   : > { %934 = vmax.xlane.f32.xlu1 %v933_v28  ;;  %v1838_v28 = vsel %vm842_vm3, %v1788_v26, 0  ;;  %v4367_v26 = vld [vmem:[#allocation2 + $0xb0] sm:$0xff] }
 0x280   : > { %2961 = vmatpush3.bf16.xpose.msra.mxu1 %v1838_v28 }
 0x283   : > { %928 = vmax.xlane.f32.xlu1 %v927_v31  ;;  %v4338_v31 = vld [vmem:[#allocation2 + $0x28] sm:$0xff] }
 0x287   : > { %937 = vmax.xlane.f32.xlu1 %v936_v34 }
 0x2b0   : > { %v851_v40 = vpop.xlane.xlu1 %850 }
 0x2b1   : > { %v4278_v41 = vmax.f32 %v4275_v36, %v851_v40 }
 0x2b3   : > { %2067 = vst.msk [vmem:[#allocation2 + $0x10] sm:$0xff] %vm439_vm2, %v4278_v41  ;;  %1079 = vperm.xlu1 %3146, %v4278_v41  }
 0x2b4   : > { %v845_v47 = vpop.xlane.xlu1 %844 }
 0x2b5   : > { %v939_v48 = vmax.f32 %v810_v44, %v845_v47 }
 0x2b7   : > { %2065 = vst.msk [vmem:[#allocation2] sm:$0xff] %vm439_vm2, %v939_v48  ;;  %1069 = vperm.xlu0 %3147, %v939_v48   ;;  %v971_v24 = vsub.f32 %v810_v44, %v939_v48  ;;  %v4348_v48 = vld [vmem:[#allocation2 + $0x40] sm:$0xff] }
 0x2b8   : > { %v854_v52 = vpop.xlane.xlu1 %853 }
 0x2b9   : > { %v4287_v55 = vmax.f32 %v4283_v50, %v854_v52  ;;  %v1003_v40 = vmul.f32 1.442695, %v971_v24 }
 0x2bb   : > { %2068 = vst.msk [vmem:[#allocation2 + $0x18] sm:$0xff] %vm439_vm2, %v4287_v55  ;;  %1084 = vperm.xlu1 %3146, %v4287_v55   ;;  %3149 = vpow2.f32 %v1003_v40 }
 0x2bc   : > { %v848_v61 = vpop.xlane.xlu1 %847 }
 0x2bd   : > { %v4295_v63 = vmax.f32 %v4289_v56, %v848_v61 }
 0x2bf   : > { %2066 = vst.msk [vmem:[#allocation2 + $0x8] sm:$0xff] %vm439_vm2, %v4295_v63  ;;  %1074 = vperm.xlu1 %3146, %v4295_v63  }
 0x2c0   : > { %v863_v3 = vpop.xlane.xlu1 %862 }
 0x2c1   : > { %v4303_v5 = vmax.f32 %v4297_v0, %v863_v3  ;;  %v4356_v3 = vld [vmem:[#allocation2 + $0x50] sm:$0xff] }
 0x2c2   : > { %5153 = vst [vmem:[#allocation33_spill] sm:$0xff] %v4356_v3 }
 0x2c3   : > { %2071 = vst.msk [vmem:[#allocation2 + $0x30] sm:$0xff] %vm439_vm2, %v4303_v5  ;;  %1099 = vperm.xlu1 %3146, %v4303_v5   ;;  %v872_v13 = vpop.xlane.xlu0 %871 }
 0x2c4   : > { %v857_v15 = vpop.xlane.xlu1 %856  ;;  %v4315_v18 = vmax.f32 %v4305_v7, %v872_v13 }
 0x2c5   : > { %v4318_v20 = vmax.f32 %v4307_v8, %v857_v15  ;;  %v4380_v13 = vpop.eup %3149 }
 0x2c6   : > { %2074 = vst.msk [vmem:[#allocation2 + $0x48] sm:$0xff] %vm439_vm2, %v4315_v18  ;;  %5157 = vst [vmem:[#allocation37_spill] sm:$0xff] %v4380_v13 }
 0x2c7   : > { %2069 = vst.msk [vmem:[#allocation2 + $0x20] sm:$0xff] %vm439_vm2, %v4318_v20  ;;  %1089 = vperm.xlu1 %3146, %v4318_v20  }
 0x2c8   : > { %v866_v25 = vpop.xlane.xlu1 %865 }
 0x2c9   : > { %v4334_v27 = vmax.f32 %v4320_v21, %v866_v25  ;;  %v4365_v25 = vld [vmem:[#allocation2 + $0x58] sm:$0xff] }
 0x2ca   : > { %5155 = vst [vmem:[#allocation35_spill] sm:$0xff] %v4365_v25 }
 0x2cb   : > { %2072 = vst.msk [vmem:[#allocation2 + $0x38] sm:$0xff] %vm439_vm2, %v4334_v27  ;;  %1104 = vperm.xlu1 %3146, %v4334_v27  }
 0x2cc   : > { %v860_v44 = vpop.xlane.xlu1 %859 }
 0x2cd   : > { %v4346_v47 = vmax.f32 %v4338_v31, %v860_v44 }
 0x2cf   : > { %2070 = vst.msk [vmem:[#allocation2 + $0x28] sm:$0xff] %vm439_vm2, %v4346_v47  ;;  %1094 = vperm.xlu0 %3147, %v4346_v47  }
 0x2d0   : > { %v869_v52 = vpop.xlane.xlu1 %868 }
 0x2d1   : > { %v4354_v61 = vmax.f32 %v4348_v48, %v869_v52 }
 0x2d3   : > { %2073 = vst.msk [vmem:[#allocation2 + $0x40] sm:$0xff] %vm439_vm2, %v4354_v61 }
 0x2d4   : > { %v875_v15 = vpop.xlane.xlu1 %874 }
 0x2d5   : > { %v4363_v24 = vmax.f32 %v4356_v3, %v875_v15 }
 0x2d7   : > { %5154 = vst [vmem:[#allocation34_spill] sm:$0xff] %v4363_v24  ;;  %2075 = vst.msk [vmem:[#allocation2 + $0x50] sm:$0xff] %vm439_vm2, %v4363_v24  ;;  %1119 = vperm.xlu1 %3146, %v4363_v24   ;;  %v4404_v24 = vld [vmem:[#allocation2 + $0xd0] sm:$0xff] }
 0x2d8   : > { %v878_v40 = vpop.xlane.xlu1 %877  ;;  %v911_v44 = vpop.xlane.xlu0 %910  ;;  %5161 = vst [vmem:[#allocation41_spill] sm:$0xff] %v4404_v24 }
 0x2d9   : > { %v4375_v52 = vmax.f32 %v4365_v25, %v878_v40  ;;  %v4378_v15 = vmax.f32 %v4367_v26, %v911_v44  ;;  %v974_v40 = vsub.f32 %v4283_v50, %v4287_v55  ;;  %v4402_v25 = vld [vmem:[#allocation2 + $0x60] sm:$0xff] }
 0x2da   : > { %5160 = vst [vmem:[#allocation40_spill] sm:$0xff] %v4402_v25 }
 0x2db   : > { %5156 = vst [vmem:[#allocation36_spill] sm:$0xff] %v4375_v52  ;;  %2076 = vst.msk [vmem:[#allocation2 + $0x58] sm:$0xff] %vm439_vm2, %v4375_v52  ;;  %1124 = vperm.xlu0 %3147, %v4375_v52   ;;  %1582 = vperm.xlu1 %3146, %v4380_v13   ;;  %v1009_v50 = vmul.f32 1.442695, %v974_v40  ;;  %v4420_v52 = vld [vmem:[#allocation2 + $0x78] sm:$0xff]  ;;  %v828_v40 = vld [vmem:[#allocation2 + $0x90] sm:$0xff] }
 0x2dc   : > { %2087 = vst.msk [vmem:[#allocation2 + $0xb0] sm:$0xff] %vm439_vm2, %v4378_v15  ;;  %v887_v44 = vpop.xlane.xlu1 %886  ;;  %v905_v34 = vpop.xlane.xlu0 %904  ;;  %5163 = vst [vmem:[#allocation43_spill] sm:$0xff] %v4420_v52 }
 0x2dd   : > { %v4397_v23 = vmax.f32 %v4382_v22, %v887_v44  ;;  %v4400_v28 = vmax.f32 %v4384_v11, %v905_v34  ;;  %v4422_v22 = vld [vmem:[#allocation2 + $0xc0] sm:$0xff]  ;;  %3151 = vpow2.f32 %v1009_v50 }
 0x2df   : > { %5159 = vst [vmem:[#allocation39_spill] sm:$0xff] %v4397_v23  ;;  %2079 = vst.msk [vmem:[#allocation2 + $0x70] sm:$0xff] %vm439_vm2, %v4397_v23  ;;  %1114 = vperm.xlu0 %3147, %v4315_v18   ;;  %1109 = vperm.xlu1 %3146, %v4354_v61  }
 0x2e0   : > { %2085 = vst.msk [vmem:[#allocation2 + $0xa0] sm:$0xff] %vm439_vm2, %v4400_v28  ;;  %v881_v55 = vpop.xlane.xlu1 %880  ;;  %v923_v34 = vpop.xlane.xlu0 %922 }
 0x2e1   : > { %v4415_v44 = vmax.f32 %v4402_v25, %v881_v55  ;;  %v4418_v3 = vmax.f32 %v4404_v24, %v923_v34  ;;  %v972_v55 = vsub.f32 %v4289_v56, %v4295_v63  ;;  %v4441_v25 = vld [vmem:[#allocation2 + $0x68] sm:$0xff]  ;;  %v973_v56 = vsub.f32 %v4275_v36, %v4278_v41 }
 0x2e2   : > { %5165 = vst [vmem:[#allocation45_spill] sm:$0xff] %v4441_v25  ;;  %v4485_v24 = vld [vmem:[#allocation2 + $0xa8] sm:$0xff] }
 0x2e3   : > { %5162 = vst [vmem:[#allocation42_spill] sm:$0xff] %v4415_v44  ;;  %2077 = vst.msk [vmem:[#allocation2 + $0x60] sm:$0xff] %vm439_vm2, %v4415_v44  ;;  %1139 = vperm.xlu1 %3146, %v4397_v23   ;;  %v826_v23 = vld [vmem:[#allocation2 + $0x80] sm:$0xff] }
 0x2e4   : > { %2091 = vst.msk [vmem:[#allocation2 + $0xd0] sm:$0xff] %vm439_vm2, %v4418_v3  ;;  %v890_v34 = vpop.xlane.xlu1 %889  ;;  %v917_v19 = vpop.xlane.xlu0 %916 }
 0x2e5   : > { %v4436_v16 = vmax.f32 %v4420_v52, %v890_v34  ;;  %v4439_v13 = vmax.f32 %v4422_v22, %v917_v19  ;;  %v1005_v19 = vmul.f32 1.442695, %v972_v55  ;;  %v4456_v34 = vld [vmem:[#allocation2 + $0xe8] sm:$0xff] }
 0x2e6   : > { %5167 = vst [vmem:[#allocation47_spill] sm:$0xff] %v4456_v34 }
 0x2e7   : > { %5164 = vst [vmem:[#allocation44_spill] sm:$0xff] %v4436_v16  ;;  %2080 = vst.msk [vmem:[#allocation2 + $0x78] sm:$0xff] %vm439_vm2, %v4436_v16  ;;  %1144 = vperm.xlu0 %3147, %v4436_v16   ;;  %1129 = vperm.xlu1 %3146, %v4415_v44   ;;  %v1007_v44 = vmul.f32 1.442695, %v973_v56  ;;  %3153 = vpow2.f32 %v1005_v19 }
 0x2e8   : > { %2089 = vst.msk [vmem:[#allocation2 + $0xc0] sm:$0xff] %vm439_vm2, %v4439_v13  ;;  %v884_v63 = vpop.xlane.xlu1 %883 }
 0x2e9   : > { %v4454_v50 = vmax.f32 %v4441_v25, %v884_v63  ;;  %v4466_v63 = vpop.eup %3151  ;;  %3155 = vpow2.f32 %v1007_v44  ;;  %v827_v25 = vld [vmem:[#allocation2 + $0x88] sm:$0xff] }
 0x2ea   : > { %5168 = vst [vmem:[#allocation48_spill] sm:$0xff] %v4466_v63 }
 0x2eb   : > { %5166 = vst [vmem:[#allocation46_spill] sm:$0xff] %v4454_v50  ;;  %2078 = vst.msk [vmem:[#allocation2 + $0x68] sm:$0xff] %vm439_vm2, %v4454_v50  ;;  %1134 = vperm.xlu0 %3147, %v4454_v50   ;;  %v932_v16 = vpop.xlane.xlu0 %931 }
 0x2ec   : > { %v899_v36 = vpop.xlane.xlu1 %898  ;;  %v4464_v41 = vmax.f32 %v4456_v34, %v932_v16  ;;  %v829_v16 = vld [vmem:[#allocation2 + $0x98] sm:$0xff] }
 0x2ed   : > { %v957_v55 = vmax.f32 %v828_v40, %v899_v36  ;;  %v976_v36 = vsub.f32 %v4338_v31, %v4346_v47  ;;  %v833_v47 = vld [vmem:[#allocation2 + $0xb8] sm:$0xff] }
 0x2ee   : > { %2094 = vst.msk [vmem:[#allocation2 + $0xe8] sm:$0xff] %vm439_vm2, %v4464_v41 }
 0x2ef   : > { %2083 = vst.msk [vmem:[#allocation2 + $0x90] sm:$0xff] %vm439_vm2, %v957_v55  ;;  %1597 = vperm.xlu0 %3147, %v4466_v63   ;;  %1159 = vperm.xlu1 %3146, %v957_v55   ;;  %v989_v52 = vsub.f32 %v828_v40, %v957_v55  ;;  %v1013_v14 = vmul.f32 1.442695, %v976_v36 }
 0x2f0   : > { %v893_v56 = vpop.xlane.xlu1 %892 }
 0x2f1   : > { %v955_v19 = vmax.f32 %v826_v23, %v893_v56  ;;  %v4477_v50 = vpop.eup %3153  ;;  %v1039_v44 = vmul.f32 1.442695, %v989_v52  ;;  %3157 = vpow2.f32 %v1013_v14 }
 0x2f3   : > { %2081 = vst.msk [vmem:[#allocation2 + $0x80] sm:$0xff] %vm439_vm2, %v955_v19  ;;  %1149 = vperm.xlu1 %3146, %v955_v19   ;;  %v4481_v31 = vpop.eup %3155  ;;  %3159 = vpow2.f32 %v1039_v44 }
 0x2f4   : > { %v902_v17 = vpop.xlane.xlu1 %901 }
 0x2f5   : > { %v958_v34 = vmax.f32 %v829_v16, %v902_v17  ;;  %v987_v17 = vsub.f32 %v826_v23, %v955_v19 }
 0x2f7   : > { %2084 = vst.msk [vmem:[#allocation2 + $0x98] sm:$0xff] %vm439_vm2, %v958_v34  ;;  %1164 = vperm.xlu0 %3147, %v958_v34   ;;  %1587 = vperm.xlu1 %3146, %v4477_v50   ;;  %v990_v56 = vsub.f32 %v829_v16, %v958_v34  ;;  %v1035_v52 = vmul.f32 1.442695, %v987_v17  ;;  %v4490_v16 = vld [vmem:[#allocation2 + $0xd8] sm:$0xff] }
 0x2f8   : > { %v896_v63 = vpop.xlane.xlu1 %895 }
 0x2f9   : > { %v956_v12 = vmax.f32 %v827_v25, %v896_v63  ;;  %v1041_v40 = vmul.f32 1.442695, %v990_v56 }
 0x2fb   : > { %2082 = vst.msk [vmem:[#allocation2 + $0x88] sm:$0xff] %vm439_vm2, %v956_v12  ;;  %1154 = vperm.xlu0 %3147, %v956_v12   ;;  %1592 = vperm.xlu1 %3146, %v4481_v31   ;;  %3161 = vpow2.f32 %v1041_v40  ;;  %v988_v14 = vsub.f32 %v827_v25, %v956_v12  ;;  %v4494_v44 = vpop.eup %3157  ;;  %v4501_v12 = vld [vmem:[#allocation2 + $0xc8] sm:$0xff]  ;;  %v5171_v40 = vsub.f32 %v4307_v8, %v4318_v20 }
 0x2fc   : > { %v914_v55 = vpop.xlane.xlu1 %913  ;;  %3163 = vpow2.f32 %v1035_v52  ;;  %5169 = vst [vmem:[#allocation49_spill] sm:$0xff] %v4494_v44  ;;  %v5172_v8 = vsub.f32 %v4320_v21, %v4334_v27 }
 0x2fd   : > { %v962_v36 = vmax.f32 %v833_v47, %v914_v55  ;;  %v1037_v23 = vmul.f32 1.442695, %v988_v14  ;;  %v4499_v17 = vpop.eup %3159  ;;  %v1011_v55 = vmul.f32 1.442695, %v5171_v40 }
 0x2fe   : > { %5170 = vst [vmem:[#allocation50_spill] sm:$0xff] %v4499_v17  ;;  %v1017_v20 = vmul.f32 1.442695, %v5172_v8 }
 0x2ff   : > { %2088 = vst.msk [vmem:[#allocation2 + $0xb8] sm:$0xff] %vm439_vm2, %v962_v36  ;;  %1184 = vperm.xlu0 %3147, %v962_v36   ;;  %1179 = vperm.xlu1 %3146, %v4378_v15   ;;  %3165 = vpow2.f32 %v1037_v23  ;;  %v994_v23 = vsub.f32 %v833_v47, %v962_v36 }
 0x300   : > { %v908_v34 = vpop.xlane.xlu1 %907  ;;  %3167 = vpow2.f32 %v1011_v55  ;;  %v4543_v55 = vld [vmem:[#allocation2 + $0xf8] sm:$0xff] }
 0x301   : > { %v960_v63 = vmax.f32 %v4485_v24, %v908_v34  ;;  %3169 = vpow2.f32 %v1017_v20  ;;  %v1049_v21 = vmul.f32 1.442695, %v994_v23 }
 0x303   : > { %2086 = vst.msk [vmem:[#allocation2 + $0xa8] sm:$0xff] %vm439_vm2, %v960_v63  ;;  %1174 = vperm.xlu0 %3147, %v960_v63   ;;  %1169 = vperm.xlu1 %3146, %v4400_v28   ;;  %v992_v20 = vsub.f32 %v4485_v24, %v960_v63  ;;  %v5174_v24 = vsub.f32 %v4297_v0, %v4303_v5 }
 0x304   : > { %v926_v19 = vpop.xlane.xlu1 %925  ;;  %v5176_v0 = vsub.f32 %v4348_v48, %v4354_v61 }
 0x305   : > { %v4497_v56 = vmax.f32 %v4490_v16, %v926_v19  ;;  %v4513_v34 = vpop.eup %3161  ;;  %v4515_v19 = vld [vmem:[#allocation2 + $0xf0] sm:$0xff]  ;;  %v1015_v63 = vmul.f32 1.442695, %v5174_v24 }
 0x306   : > { %v4528_v25 = vpop.eup %3163  ;;  %v1019_v5 = vmul.f32 1.442695, %v5176_v0 }
 0x307   : > { %1607 = vperm.xlu0 %3147, %v4494_v44   ;;  %1672 = vperm.xlu1 %3146, %v4499_v17   ;;  %2092 = vst.msk [vmem:[#allocation2 + $0xd8] sm:$0xff] %vm439_vm2, %v4497_v56  ;;  %v991_v17 = vsub.f32 %v4384_v11, %v4400_v28  ;;  %v4530_v44 = vld [vmem:[#allocation2 + $0xe0] sm:$0xff]  ;;  %v5175_v28 = vsub.f32 %v4305_v7, %v4315_v18 }
 0x308   : > { %v920_v52 = vpop.xlane.xlu1 %919 }
 0x309   : > { %v964_v14 = vmax.f32 %v4501_v12, %v920_v52  ;;  %v1043_v11 = vmul.f32 1.442695, %v991_v17  ;;  %v4541_v36 = vpop.eup %3165  ;;  %v993_v17 = vsub.f32 %v4367_v26, %v4378_v15 }
 0x30b   : > { %1677 = vperm.xlu0 %3147, %v4513_v34   ;;  %1199 = vperm.xlu1 %3146, %v4418_v3   ;;  %2090 = vst.msk [vmem:[#allocation2 + $0xc8] sm:$0xff] %vm439_vm2, %v964_v14  ;;  %3171 = vpow2.f32 %v1043_v11  ;;  %v1047_v26 = vmul.f32 1.442695, %v993_v17  ;;  %v1045_v11 = vmul.f32 1.442695, %v992_v20 }
 0x30c   : > { %v935_v40 = vpop.xlane.xlu1 %934  ;;  %3173 = vpow2.f32 %v1049_v21  ;;  %v1021_v20 = vmul.f32 1.442695, %v5175_v28 }
 0x30d   : > { %v4526_v52 = vmax.f32 %v4515_v19, %v935_v40  ;;  %3175 = vpow2.f32 %v1047_v26  ;;  %v995_v26 = vsub.f32 %v4422_v22, %v4439_v13 }
 0x30e   : > { %3177 = vpow2.f32 %v1045_v11  ;;  %v996_v11 = vsub.f32 %v4501_v12, %v964_v14 }
 0x30f   : > { %5173 = vst [vmem:[#allocation51_spill] sm:$0xff] %v4526_v52  ;;  %1204 = vperm.xlu0 %3147, %v4497_v56   ;;  %1662 = vperm.xlu1 %3146, %v4528_v25   ;;  %2095 = vst.msk [vmem:[#allocation2 + $0xf0] sm:$0xff] %vm439_vm2, %v4526_v52  ;;  %3179 = vpow2.f32 %v1015_v63  ;;  %v1051_v24 = vmul.f32 1.442695, %v995_v26 }
 0x310   : > { %v929_v27 = vpop.xlane.xlu1 %928  ;;  %3181 = vpow2.f32 %v1021_v20  ;;  %v1053_v7 = vmul.f32 1.442695, %v996_v11 }
 0x311   : > { %v4539_v47 = vmax.f32 %v4530_v44, %v929_v27  ;;  %v4557_v27 = vpop.eup %3167  ;;  %3183 = vpow2.f32 %v1019_v5 }
 0x312   : > { %v4564_v21 = vpop.eup %3169  ;;  %3185 = vpow2.f32 %v1051_v24 }
 0x313   : > { %1667 = vperm.xlu0 %3147, %v4541_v36   ;;  %1189 = vperm.xlu1 %3146, %v4439_v13   ;;  %2093 = vst.msk [vmem:[#allocation2 + $0xe0] sm:$0xff] %vm439_vm2, %v4539_v47  ;;  %3187 = vpow2.f32 %v1053_v7 }
 0x314   : > { %v938_v23 = vpop.xlane.xlu1 %937 }
 0x315   : > { %v4555_v40 = vmax.f32 %v4543_v55, %v938_v23  ;;  %v4571_v17 = vpop.eup %3171 }
 0x316   : > { %v4573_v23 = vpop.eup %3173 }
 0x317   : > { %1194 = vperm.xlu0 %3147, %v964_v14   ;;  %1602 = vperm.xlu1 %3146, %v4557_v27   ;;  %2096 = vst.msk [vmem:[#allocation2 + $0xf8] sm:$0xff] %vm439_vm2, %v4555_v40  ;;  %v4588_v18 = vpop.eup %3175 }
 0x318   : > { %v4590_v22 = vpop.eup %3177 }
 0x319   : > { %v4594_v48 = vpop.eup %3179 }
 0x31a   : > { %v4598_v61 = vpop.eup %3181 }
 0x31b   : > { %1617 = vperm.xlu0 %3147, %v4564_v21   ;;  %1219 = vperm.xlu1 %3146, %v4526_v52   ;;  %v4600_v13 = vpop.eup %3183 }
 0x31c   : > { %v4604_v12 = vpop.eup %3185 }
 0x31d   : > { %5177 = vst [vmem:[#allocation52_spill] sm:$0xff] %v4604_v12  ;;  %v4606_v14 = vpop.eup %3187 }
 0x31e   : > { %5178 = vst [vmem:[#allocation53_spill] sm:$0xff] %v4606_v14 }
 0x31f   : > { %1697 = vperm.xlu0 %3147, %v4573_v23   ;;  %1682 = vperm.xlu1 %3146, %v4571_v17  }
 0x323   : > { %1224 = vperm.xlu0 %3147, %v4555_v40   ;;  %1209 = vperm.xlu1 %3146, %v4539_v47  }
 0x327   : > { %1687 = vperm.xlu0 %3147, %v4590_v22   ;;  %1692 = vperm.xlu1 %3146, %v4588_v18  }
 0x32b   : > { %1214 = vperm.xlu0 %3147, %v4464_v41   ;;  %1612 = vperm.xlu1 %3146, %v4594_v48  }
 0x32f   : > { %1627 = vperm.xlu0 %3147, %v4598_v61   ;;  %1622 = vperm.xlu1 %3146, %v4600_v13  }
 0x332   : > { %v1080_v28 = vpop.permute.xlu1 %1079 }
 0x333   : > { %1707 = vperm.xlu0 %3147, %v4606_v14   ;;  %1702 = vperm.xlu1 %3146, %v4604_v12   ;;  %v1229_v63 = vsub.f32 %v4016_v29, %v1080_v28 }
 0x335   : > { %v1263_v26 = vmul.f32 1.442695, %v1229_v63 }
 0x336   : > { %v1070_v20 = vpop.permute.xlu0 %1069 }
 0x337   : > { %v1227_v0 = vsub.f32 %v4018_v30, %v1070_v20  ;;  %3189 = vpow2.f32 %v1263_v26 }
 0x339   : > { %v1259_v7 = vmul.f32 1.442695, %v1227_v0 }
 0x33a   : > { %v1085_v5 = vpop.permute.xlu1 %1084 }
 0x33b   : > { %v1230_v11 = vsub.f32 %v4022_v32, %v1085_v5 }
 0x33d   : > { %v1265_v24 = vmul.f32 1.442695, %v1230_v11 }
 0x33e   : > { %v1075_v15 = vpop.permute.xlu1 %1074 }
 0x33f   : > { %3191 = vpow2.f32 %v1265_v24  ;;  %v1228_v8 = vsub.f32 %v4024_v33, %v1075_v15 }
 0x340   : > { %3193 = vpow2.f32 %v1259_v7 }
 0x341   : > { %v1261_v52 = vmul.f32 1.442695, %v1228_v8  ;;  %v3190_v63 = vpop.eup %3189 }
 0x342   : > { %v1100_v14 = vpop.permute.xlu1 %1099  ;;  %v1393_v7 = vsel %vm842_vm3, %v3190_v63, 0.0 }
 0x343   : > { %3195 = vpow2.f32 %v1261_v52  ;;  %v1233_v29 = vsub.f32 %v4028_v35, %v1100_v14 }
 0x345   : > { %v1271_v30 = vmul.f32 1.442695, %v1233_v29 }
 0x346   : > { %v1090_v28 = vpop.permute.xlu1 %1089 }
 0x347   : > { %v1231_v20 = vsub.f32 %v4032_v37, %v1090_v28  ;;  %3197 = vpow2.f32 %v1271_v30 }
 0x349   : > { %v3192_v12 = vpop.eup %3191  ;;  %v1267_v33 = vmul.f32 1.442695, %v1231_v20 }
 0x34a   : > { %v1105_v32 = vpop.permute.xlu1 %1104  ;;  %v1773_v5 = vpack.c.bf16 %v3192_v12, %v3190_v63  ;;  %v3194_v0 = vpop.eup %3193 }
 0x34b   : > { %v1234_v26 = vsub.f32 %v4034_v38, %v1105_v32  ;;  %v1387_v37 = vsel %vm842_vm3, %v3194_v0, 0.0  ;;  %v1396_v38 = vsel %vm842_vm3, %v3192_v12, 0.0 }
 0x34d   : > { %v3196_v11 = vpop.eup %3195  ;;  %v1273_v8 = vmul.f32 1.442695, %v1234_v26 }
 0x34e   : > { %v1095_v15 = vpop.permute.xlu0 %1094  ;;  %v1772_v24 = vpack.c.bf16 %v3196_v11, %v3194_v0  ;;  %v1390_v20 = vsel %vm842_vm3, %v3196_v11, 0.0 }
 0x34f   : > { %3199 = vpow2.f32 %v1273_v8  ;;  %v1232_v35 = vsub.f32 %v4036_v39, %v1095_v15 }
 0x350   : > { %2962 = vmatprep.mubr.msk.bf16.mxu1 %vm842_vm3, %v1772_v24  ;;  %3201 = vpow2.f32 %v1267_v33 }
 0x351   : > { %v1269_v52 = vmul.f32 1.442695, %v1232_v35  ;;  %2963 = vmatmul.mubr.msk.bf16.vlgmr.msra.gmra.mrb[0].mxu1 %vm842_vm3, %v1773_v5  ;;  %v3198_v29 = vpop.eup %3197 }
 0x352   : > { %1388 = vadd.xlane.f32.xlu0 %v1387_v37  ;;  %v1405_v26 = vsel %vm842_vm3, %v3198_v29, 0.0 }
 0x353   : > { %3203 = vpow2.f32 %v1269_v52 }
 0x356   : > { %v1120_v14 = vpop.permute.xlu1 %1119  ;;  %1397 = vadd.xlane.f32.xlu0 %v1396_v38 }
 0x357   : > { %v1237_v28 = vsub.f32 %v4042_v42, %v1120_v14  ;;  %1394 = vadd.xlane.f32.xlu1 %v1393_v7 }
 0x359   : > { %v3200_v39 = vpop.eup %3199  ;;  %v1279_v30 = vmul.f32 1.442695, %v1237_v28 }
 0x35a   : > { %1391 = vadd.xlane.f32.xlu0 %v1390_v20  ;;  %v1125_v32 = vpop.permute.xlu0 %1124  ;;  %v4625_v5 = vpop.permute.xlu1 %1582  ;;  %v1775_v0 = vpack.c.bf16 %v3200_v39, %v3198_v29  ;;  %v1408_v42 = vsel %vm842_vm3, %v3200_v39, 0.0 }
 0x35b   : > { %v3202_v12 = vpop.eup %3201  ;;  %3205 = vpow2.f32 %v1279_v30  ;;  %v1238_v33 = vsub.f32 %v4046_v45, %v1125_v32  ;;  %1406 = vadd.xlane.f32.xlu1 %v1405_v26 }
 0x35c   : > { %v1399_v11 = vsel %vm842_vm3, %v3202_v12, 0.0 }
 0x35d   : > { %v3204_v63 = vpop.eup %3203  ;;  %v1281_v8 = vmul.f32 1.442695, %v1238_v33 }
 0x35e   : > { %1409 = vadd.xlane.f32.xlu0 %v1408_v42  ;;  %v1115_v15 = vpop.permute.xlu0 %1114  ;;  %v1110_v24 = vpop.permute.xlu1 %1109  ;;  %v1774_v35 = vpack.c.bf16 %v3204_v63, %v3202_v12  ;;  %v1402_v14 = vsel %vm842_vm3, %v3204_v63, 0.0 }
 0x35f   : > { %3207 = vpow2.f32 %v1281_v8  ;;  %v1236_v52 = vsub.f32 %v4048_v46, %v1115_v15  ;;  %v1235_v37 = vsub.f32 %v4044_v43, %v1110_v24  ;;  %1400 = vadd.xlane.f32.xlu1 %v1399_v11 }
 0x360   : > { %2966 = vmatprep.mubr.msk.bf16.mxu1 %vm842_vm3, %v1774_v35 }
 0x361   : > { %v1277_v45 = vmul.f32 1.442695, %v1236_v52  ;;  %v1275_v38 = vmul.f32 1.442695, %v1235_v37  ;;  %2967 = vmatmul.mubr.msk.bf16.gmra.mrb[4].mxu1 %vm842_vm3, %v1775_v0 }
 0x362   : > { %1403 = vadd.xlane.f32.xlu0 %v1402_v14  ;;  %v1140_v7 = vpop.permute.xlu1 %1139 }
 0x363   : > { %3209 = vpow2.f32 %v1277_v45  ;;  %v1241_v29 = vsub.f32 %v4054_v49, %v1140_v7 }
 0x364   : > { %3211 = vpow2.f32 %v1275_v38 }
 0x365   : > { %v3206_v28 = vpop.eup %3205  ;;  %v1287_v39 = vmul.f32 1.442695, %v1241_v29 }
 0x366   : > { %v1145_v46 = vpop.permute.xlu0 %1144  ;;  %v1130_v30 = vpop.permute.xlu1 %1129  ;;  %v1417_v43 = vsel %vm842_vm3, %v3206_v28, 0.0 }
 0x367   : > { %3213 = vpow2.f32 %v1287_v39  ;;  %v1242_v20 = vsub.f32 %v4191_v53, %v1145_v46  ;;  %v1239_v32 = vsub.f32 %v4060_v51, %v1130_v30  ;;  %1418 = vadd.xlane.f32.xlu1 %v1417_v43 }
 0x369   : > { %v3208_v26 = vpop.eup %3207  ;;  %v1289_v0 = vmul.f32 1.442695, %v1242_v20  ;;  %v1283_v12 = vmul.f32 1.442695, %v1239_v32 }
 0x36a   : > { %v1135_v33 = vpop.permute.xlu0 %1134  ;;  %v1420_v63 = vsel %vm842_vm3, %v3208_v26, 0.0  ;;  %v1777_v49 = vpack.c.bf16 %v3208_v26, %v3206_v28 }
 0x36b   : > { %3215 = vpow2.f32 %v1289_v0  ;;  %v1240_v8 = vsub.f32 %v4193_v54, %v1135_v33  ;;  %1421 = vadd.xlane.f32.xlu0 %v1420_v63 }
 0x36c   : > { %3217 = vpow2.f32 %v1283_v12 }
 0x36d   : > { %v3210_v42 = vpop.eup %3209  ;;  %v1285_v15 = vmul.f32 1.442695, %v1240_v8 }
 0x36e   : > { %v3212_v24 = vpop.eup %3211  ;;  %v1160_v11 = vpop.permute.xlu1 %1159  ;;  %v1414_v53 = vsel %vm842_vm3, %v3210_v42, 0.0 }
 0x36f   : > { %3219 = vpow2.f32 %v1285_v15  ;;  %v1245_v51 = vsub.f32 %v4199_v57, %v1160_v11  ;;  %1415 = vadd.xlane.f32.xlu0 %v1414_v53  ;;  %v1411_v35 = vsel %vm842_vm3, %v3212_v24, 0.0  ;;  %v1776_v52 = vpack.c.bf16 %v3210_v42, %v3212_v24  ;;  %v4645_v38 = vpop.permute.xlu0 %1597 }
 0x370   : > { %1412 = vadd.xlane.f32.xlu1 %v1411_v35 }
 0x371   : > { %v3214_v37 = vpop.eup %3213  ;;  %v1295_v45 = vmul.f32 1.442695, %v1245_v51  ;;  %2970 = vmatprep.mubr.msk.bf16.mxu1 %vm842_vm3, %v1776_v52 }
 0x372   : > { %v1150_v54 = vpop.permute.xlu1 %1149  ;;  %v1429_v14 = vsel %vm842_vm3, %v3214_v37, 0.0  ;;  %2971 = vmatmul.mubr.msk.bf16.gmra.mrb[8].mxu1 %vm842_vm3, %v1777_v49 }
 0x373   : > { %3221 = vpow2.f32 %v1295_v45  ;;  %v1243_v7 = vsub.f32 %v4201_v58, %v1150_v54 }
 0x374   : > { %1430 = vadd.xlane.f32.xlu1 %v1429_v14 }
 0x375   : > { %v3216_v57 = vpop.eup %3215  ;;  %v1291_v29 = vmul.f32 1.442695, %v1243_v7 }
 0x376   : > { %v3218_v28 = vpop.eup %3217  ;;  %v1165_v39 = vpop.permute.xlu0 %1164  ;;  %v1432_v30 = vsel %vm842_vm3, %v3216_v57, 0.0  ;;  %v1779_v43 = vpack.c.bf16 %v3216_v57, %v3214_v37 }
 0x377   : > { %v4651_v46 = vpop.permute.xlu1 %1587  ;;  %3223 = vpow2.f32 %v1291_v29  ;;  %v1246_v20 = vsub.f32 %v4203_v59, %v1165_v39  ;;  %1433 = vadd.xlane.f32.xlu0 %v1432_v30  ;;  %v1423_v32 = vsel %vm842_vm3, %v3218_v28, 0.0 }
 0x378   : > { %1424 = vadd.xlane.f32.xlu1 %v1423_v32 }
 0x379   : > { %v3220_v26 = vpop.eup %3219  ;;  %v1297_v0 = vmul.f32 1.442695, %v1246_v20 }
 0x37a   : > { %v1155_v58 = vpop.permute.xlu0 %1154  ;;  %v1426_v33 = vsel %vm842_vm3, %v3220_v26, 0.0  ;;  %v1778_v63 = vpack.c.bf16 %v3220_v26, %v3218_v28 }
 0x37b   : > { %v4656_v12 = vpop.permute.xlu1 %1592  ;;  %3225 = vpow2.f32 %v1297_v0  ;;  %v1244_v49 = vsub.f32 %v4205_v60, %v1155_v58  ;;  %1427 = vadd.xlane.f32.xlu0 %v1426_v33 }
 0x37c   : > { %2974 = vmatprep.mubr.msk.bf16.mxu1 %vm842_vm3, %v1778_v63 }
 0x37d   : > { %v3222_v8 = vpop.eup %3221  ;;  %v1293_v59 = vmul.f32 1.442695, %v1244_v49  ;;  %2975 = vmatmul.mubr.msk.bf16.gmra.mrb[12].mxu1 %vm842_vm3, %v1779_v43 }
 0x37e   : > { %v1185_v42 = vpop.permute.xlu0 %1184  ;;  %v1441_v24 = vsel %vm842_vm3, %v3222_v8, 0.0 }
 0x37f   : > { %v1180_v15 = vpop.permute.xlu1 %1179  ;;  %3227 = vpow2.f32 %v1293_v59  ;;  %v1250_v11 = vsub.f32 %v4217_v2, %v1185_v42  ;;  %1442 = vadd.xlane.f32.xlu1 %v1441_v24 }
 0x380   : > { %v1249_v53 = vsub.f32 %v4209_v62, %v1180_v15 }
 0x381   : > { %v3224_v51 = vpop.eup %3223  ;;  %v1305_v35 = vmul.f32 1.442695, %v1250_v11 }
 0x382   : > { %v1303_v60 = vmul.f32 1.442695, %v1249_v53  ;;  %v1175_v52 = vpop.permute.xlu0 %1174  ;;  %v1435_v45 = vsel %vm842_vm3, %v3224_v51, 0.0 }
 0x383   : > { %v1170_v37 = vpop.permute.xlu1 %1169  ;;  %3229 = vpow2.f32 %v1305_v35  ;;  %v1248_v54 = vsub.f32 %v4221_v4, %v1175_v52  ;;  %1436 = vadd.xlane.f32.xlu1 %v1435_v45  ;;  %v5179_v52 = vld [vmem:[#allocation41_spill] sm:$0xff] }
 0x384   : > { %v1247_v14 = vsub.f32 %v4215_v1, %v1170_v37  ;;  %3231 = vpow2.f32 %v1303_v60  ;;  %v5180_v37 = vsub.f32 %v5179_v52, %v4418_v3 }
 0x385   : > { %v3226_v7 = vpop.eup %3225  ;;  %v1301_v57 = vmul.f32 1.442695, %v1248_v54 }
 0x386   : > { %v1299_v2 = vmul.f32 1.442695, %v1247_v14  ;;  %v4668_v29 = vpop.permute.xlu0 %1607  ;;  %v1444_v28 = vsel %vm842_vm3, %v3226_v7, 0.0  ;;  %v1781_v39 = vpack.c.bf16 %v3226_v7, %v3222_v8  ;;  %v1055_v45 = vmul.f32 1.442695, %v5180_v37  ;;  %v5186_v37 = vld [vmem:[#allocation32_spill] sm:$0xff] }
 0x387   : > { %v4670_v62 = vpop.permute.xlu1 %1672  ;;  %3233 = vpow2.f32 %v1301_v57  ;;  %1445 = vadd.xlane.f32.xlu0 %v1444_v28  ;;  %v5181_v57 = vld [vmem:[#allocation28_spill] sm:$0xff]  ;;  %v5182_v28 = vsub.f32 %v4490_v16, %v4497_v56  ;;  %v5184_v16 = vld [vmem:[#allocation31_spill] sm:$0xff] }
 0x388   : > { %3235 = vpow2.f32 %v1299_v2 }
 0x389   : > { %v3228_v30 = vpop.eup %3227 }
 0x38a   : > { %v4673_v43 = vpop.permute.xlu0 %1677  ;;  %v1438_v1 = vsel %vm842_vm3, %v3228_v30, 0.0  ;;  %v1780_v20 = vpack.c.bf16 %v3228_v30, %v3224_v51 }
 0x38b   : > { %v1200_v4 = vpop.permute.xlu1 %1199  ;;  %1439 = vadd.xlane.f32.xlu0 %v1438_v1 }
 0x38c   : > { %v1253_v32 = vsub.f32 %v4225_v6, %v1200_v4  ;;  %2978 = vmatprep.mubr.msk.bf16.mxu1 %vm842_vm3, %v1780_v20  ;;  %v5183_v20 = vld [vmem:[#allocation29_spill] sm:$0xff] }
 0x38d   : > { %v3230_v26 = vpop.eup %3229  ;;  %2979 = vmatmul.mubr.msk.bf16.gmra.mrb[16].mxu1 %vm842_vm3, %v1781_v39  ;;  %v1057_v39 = vmul.f32 1.442695, %v5182_v28 }
 0x38e   : > { %v3232_v0 = vpop.eup %3231  ;;  %v1311_v58 = vmul.f32 1.442695, %v1253_v32  ;;  %v1205_v33 = vpop.permute.xlu0 %1204  ;;  %v1456_v49 = vsel %vm842_vm3, %v3230_v26, 0.0 }
 0x38f   : > { %v4679_v63 = vpop.permute.xlu1 %1662  ;;  %v1254_v8 = vsub.f32 %v4233_v10, %v1205_v33  ;;  %1457 = vadd.xlane.f32.xlu0 %v1456_v49  ;;  %v1453_v59 = vsel %vm842_vm3, %v3232_v0, 0.0  ;;  %v1783_v6 = vpack.c.bf16 %v3230_v26, %v3232_v0 }
 0x390   : > { %1454 = vadd.xlane.f32.xlu1 %v1453_v59  ;;  %3237 = vpow2.f32 %v1311_v58 }
 0x391   : > { %v3234_v42 = vpop.eup %3233  ;;  %v1313_v15 = vmul.f32 1.442695, %v1254_v8 }
 0x392   : > { %v3236_v24 = vpop.eup %3235  ;;  %v4684_v11 = vpop.permute.xlu0 %1667  ;;  %v1450_v51 = vsel %vm842_vm3, %v3234_v42, 0.0 }
 0x393   : > { %v1190_v53 = vpop.permute.xlu1 %1189  ;;  %3239 = vpow2.f32 %v1313_v15  ;;  %1451 = vadd.xlane.f32.xlu0 %v1450_v51  ;;  %v1447_v10 = vsel %vm842_vm3, %v3236_v24, 0.0  ;;  %v1782_v60 = vpack.c.bf16 %v3234_v42, %v3236_v24  ;;  %v5185_v24 = vld [vmem:[#allocation30_spill] sm:$0xff] }
 0x394   : > { %v1251_v35 = vsub.f32 %v4231_v9, %v1190_v53  ;;  %1448 = vadd.xlane.f32.xlu1 %v1447_v10  ;;  %3241 = vpow2.f32 %v1055_v45 }
 0x395   : > { %2982 = vmatprep.mubr.msk.bf16.mxu1 %vm842_vm3, %v1782_v60 }
 0x396   : > { %v1307_v54 = vmul.f32 1.442695, %v1251_v35  ;;  %v1195_v14 = vpop.permute.xlu0 %1194  ;;  %2983 = vmatmul.mubr.msk.bf16.gmra.mrb[20].mxu1 %vm842_vm3, %v1783_v6 }
 0x397   : > { %v4693_v7 = vpop.permute.xlu1 %1602  ;;  %v1252_v2 = vsub.f32 %v5181_v57, %v1195_v14 }
 0x398   : > { %3243 = vpow2.f32 %v1307_v54 }
 0x399   : > { %v1309_v9 = vmul.f32 1.442695, %v1252_v2 }
 0x39a   : > { %v4700_v30 = vpop.permute.xlu0 %1617  ;;  %v3238_v4 = vpop.eup %3237 }
 0x39b   : > { %v1220_v3 = vpop.permute.xlu1 %1219  ;;  %3245 = vpow2.f32 %v1309_v9 }
 0x39c   : > { %3247 = vpow2.f32 %v1057_v39  ;;  %v1257_v32 = vsub.f32 %v5183_v20, %v1220_v3  ;;  %v1465_v20 = vsel %vm842_vm3, %v3238_v4, 0.0 }
 0x39d   : > { %v3240_v1 = vpop.eup %3239 }
 0x39e   : > { %v4703_v26 = vpop.permute.xlu0 %1697  ;;  %v1785_v58 = vpack.c.bf16 %v3240_v1, %v3238_v4  ;;  %v1319_v33 = vmul.f32 1.442695, %v1257_v32  ;;  %v4707_v8 = vpop.eup %3241  ;;  %v1468_v3 = vsel %vm842_vm3, %v3240_v1, 0.0 }
 0x39f   : > { %v4705_v0 = vpop.permute.xlu1 %1682 }
 0x3a0   : > { %3249 = vpow2.f32 %v1319_v33 }
 0x3a2   : > { %v1225_v49 = vpop.permute.xlu0 %1224  ;;  %v3244_v6 = vpop.eup %3243 }
 0x3a3   : > { %v1258_v56 = vsub.f32 %v5184_v16, %v1225_v49  ;;  %v1210_v59 = vpop.permute.xlu1 %1209 }
 0x3a4   : > { %v1255_v53 = vsub.f32 %v5185_v24, %v1210_v59  ;;  %v5187_v24 = vld [vmem:[#allocation37_spill] sm:$0xff] }
 0x3a5   : > { %v3246_v42 = vpop.eup %3245  ;;  %v1321_v15 = vmul.f32 1.442695, %v1258_v56  ;;  %1712 = vperm.xlu1 %3146, %v4707_v8  }
 0x3a6   : > { %v4712_v51 = vpop.permute.xlu0 %1687  ;;  %v1784_v35 = vpack.c.bf16 %v3246_v42, %v3244_v6  ;;  %v4714_v10 = vpop.eup %3247  ;;  %v1315_v60 = vmul.f32 1.442695, %v1255_v53  ;;  %v1462_v32 = vsel %vm842_vm3, %v3246_v42, 0.0 }
 0x3a7   : > { %3251 = vpow2.f32 %v1321_v15  ;;  %v4726_v33 = vpop.permute.xlu1 %1692  ;;  %v1323_v15 = vld [vmem:[#allocation3] sm:$0xff] }
 0x3a8   : > { %2986 = vmatprep.mubr.msk.bf16.mxu1 %vm842_vm3, %v1784_v35  ;;  %3253 = vpow2.f32 %v1315_v60  ;;  %v1355_v53 = vmul.f32 %v5187_v24, %v1323_v15  ;;  %v1326_v60 = vld [vmem:[#allocation3 + $0x18] sm:$0xff] }
 0x3a9   : > { %1717 = vperm.xlu0 %3147, %v4714_v10   ;;  %2987 = vmatmul.mubr.msk.bf16.gmra.mrb[24].mxu1 %vm842_vm3, %v1785_v58  ;;  %v1459_v58 = vsel %vm842_vm3, %v3244_v6, 0.0 }
 0x3aa   : > { %v1215_v52 = vpop.permute.xlu0 %1214  ;;  %v3250_v14 = vpop.eup %3249 }
 0x3ab   : > { %v1256_v45 = vsub.f32 %v5186_v37, %v1215_v52  ;;  %v1477_v16 = vsel %vm842_vm3, %v3250_v14, 0.0  ;;  %v4731_v56 = vpop.permute.xlu1 %1612 }
 0x3ad   : > { %v1317_v54 = vmul.f32 1.442695, %v1256_v45  ;;  %v1325_v45 = vld [vmem:[#allocation3 + $0x10] sm:$0xff] }
 0x3ae   : > { %v4734_v59 = vpop.permute.xlu0 %1627 }
 0x3af   : > { %3255 = vpow2.f32 %v1317_v54  ;;  %v4736_v6 = vpop.permute.xlu1 %1622  ;;  %v5188_v54 = vld [vmem:[#allocation33_spill] sm:$0xff] }
 0x3b1   : > { %v3252_v57 = vpop.eup %3251 }
 0x3b2   : > { %v1787_v2 = vpack.c.bf16 %v3252_v57, %v3250_v14  ;;  %v3254_v9 = vpop.eup %3253  ;;  %v1480_v49 = vsel %vm842_vm3, %v3252_v57, 0.0  ;;  %v4738_v42 = vpop.permute.xlu0 %1707  ;;  %v5189_v14 = vld [vmem:[#allocation34_spill] sm:$0xff] }
 0x3b3   : > { %v1471_v4 = vsel %vm842_vm3, %v3254_v9, 0.0  ;;  %v4741_v52 = vpop.permute.xlu1 %1702  ;;  %v5190_v57 = vsub.f32 %v5188_v54, %v5189_v14  ;;  %v1327_v54 = vld [vmem:[#allocation3 + $0x20] sm:$0xff] }
 0x3b9   : > { %v3256_v28 = vpop.eup %3255 }
 0x3ba   : > { %v1786_v39 = vpack.c.bf16 %v3256_v28, %v3254_v9  ;;  %v1474_v1 = vsel %vm842_vm3, %v3256_v28, 0.0  ;;  %v5191_v9 = vld [vmem:[#allocation48_spill] sm:$0xff] }
 0x3bb   : > { %v1358_v28 = vmul.f32 %v5191_v9, %v1326_v60  ;;  %v1328_v9 = vld [vmem:[#allocation3 + $0x28] sm:$0xff] }
 0x3bc   : > { %2990 = vmatprep.mubr.msk.bf16.mxu1 %vm842_vm3, %v1786_v39 }
 0x3bd   : > { %2991 = vmatmul.mubr.msk.bf16.gmra.mrb[28].mxu1 %vm842_vm3, %v1787_v2  ;;  %v1023_v2 = vmul.f32 1.442695, %v5190_v57 }
 0x3bf   : > { %3257 = vpow2.f32 %v1023_v2 }
 0x3c8   : > { %1469 = vadd.xlane.f32.xlu0 %v1468_v3  ;;  %v1357_v3 = vmul.f32 %v4481_v31, %v1325_v45  ;;  %v1330_v31 = vld [vmem:[#allocation3 + $0x38] sm:$0xff] }
 0x3c9   : > { %1466 = vadd.xlane.f32.xlu1 %v1465_v20  ;;  %v1324_v20 = vld [vmem:[#allocation3 + $0x8] sm:$0xff]  ;;  %v1362_v57 = vmul.f32 %v4564_v21, %v1330_v31 }
 0x3cc   : > { %1463 = vadd.xlane.f32.xlu0 %v1462_v32 }
 0x3cd   : > { %1460 = vadd.xlane.f32.xlu1 %v1459_v58 }
 0x3d0   : > { %1481 = vadd.xlane.f32.xlu0 %v1480_v49  ;;  %v1329_v49 = vld [vmem:[#allocation3 + $0x30] sm:$0xff] }
 0x3d1   : > { %1478 = vadd.xlane.f32.xlu1 %v1477_v16  ;;  %v1361_v60 = vmul.f32 %v4594_v48, %v1329_v49  ;;  %v5196_v48 = vld [vmem:[#allocation39_spill] sm:$0xff] }
 0x3d4   : > { %1475 = vadd.xlane.f32.xlu0 %v1474_v1  ;;  %v5192_v1 = vld [vmem:[#allocation35_spill] sm:$0xff] }
 0x3d5   : > { %1472 = vadd.xlane.f32.xlu1 %v1471_v4  ;;  %v5193_v4 = vld [vmem:[#allocation36_spill] sm:$0xff] }
 0x3d6   : > { %v5194_v15 = vsub.f32 %v5192_v1, %v5193_v4  ;;  %v5198_v1 = vld [vmem:[#allocation49_spill] sm:$0xff] }
 0x3d7   : > { %v1360_v21 = vmul.f32 %v5198_v1, %v1328_v9 }
 0x3d8   : > { %v1025_v24 = vmul.f32 1.442695, %v5194_v15  ;;  %v5199_v15 = vld [vmem:[#allocation40_spill] sm:$0xff] }
 0x3da   : > { %3259 = vpow2.f32 %v1025_v24  ;;  %v5200_v24 = vld [vmem:[#allocation42_spill] sm:$0xff] }
 0x3df   : > { %v1389_v35 = vpop.xlane.xlu0 %1388 }
 0x3e0   : > { %v1483_v37 = vadd.f32 %v1389_v35, %v1355_v53  ;;  %v1356_v53 = vmul.f32 %v4477_v50, %v1324_v20  ;;  %v1359_v50 = vmul.f32 %v4557_v27, %v1327_v54  ;;  %v4766_v27 = vpop.eup %3257  ;;  %v5203_v54 = vld [vmem:[#allocation44_spill] sm:$0xff] }
 0x3e2   : > { %1516 = vst.msk [vmem:[#allocation3] sm:$0xff] %vm439_vm2, %v1483_v37 }
 0x3e3   : > { %v1398_v39 = vpop.xlane.xlu0 %1397 }
 0x3e4   : > { %v1486_v32 = vadd.f32 %v1398_v39, %v1358_v28  ;;  %v1395_v58 = vpop.xlane.xlu1 %1394  ;;  %v4776_v9 = vpop.eup %3259 }
 0x3e5   : > { %v1485_v16 = vadd.f32 %v1395_v58, %v1357_v3  ;;  %v5195_v3 = vld [vmem:[#allocation38_spill] sm:$0xff] }
 0x3e6   : > { %1519 = vst.msk [vmem:[#allocation3 + $0x18] sm:$0xff] %vm439_vm2, %v1486_v32  ;;  %v5197_v20 = vsub.f32 %v5195_v3, %v5196_v48  ;;  %v1334_v3 = vld [vmem:[#allocation3 + $0x58] sm:$0xff] }
 0x3e7   : > { %1518 = vst.msk [vmem:[#allocation3 + $0x10] sm:$0xff] %vm439_vm2, %v1485_v16  ;;  %v1392_v35 = vpop.xlane.xlu0 %1391  ;;  %v5205_v48 = vld [vmem:[#allocation45_spill] sm:$0xff]  ;;  %v1366_v1 = vmul.f32 %v4776_v9, %v1334_v3 }
 0x3e8   : > { %v1484_v37 = vadd.f32 %v1392_v35, %v1356_v53  ;;  %v1407_v45 = vpop.xlane.xlu1 %1406  ;;  %v1031_v32 = vmul.f32 1.442695, %v5197_v20  ;;  %v5201_v53 = vsub.f32 %v5199_v15, %v5200_v24  ;;  %v5206_v20 = vld [vmem:[#allocation46_spill] sm:$0xff]  ;;  %v1332_v24 = vld [vmem:[#allocation3 + $0x48] sm:$0xff] }
 0x3e9   : > { %v1489_v14 = vadd.f32 %v1407_v45, %v1361_v60  ;;  %v2100_v60 = vld [vmem:[#allocation3] sm:$0xff]  ;;  %v5202_v45 = vld [vmem:[#allocation43_spill] sm:$0xff] }
 0x3ea   : > { %1517 = vst.msk [vmem:[#allocation3 + $0x8] sm:$0xff] %vm439_vm2, %v1484_v37  ;;  %v1027_v35 = vmul.f32 1.442695, %v5201_v53  ;;  %v1333_v37 = vld [vmem:[#allocation3 + $0x50] sm:$0xff] }
 0x3eb   : > { %1522 = vst.msk [vmem:[#allocation3 + $0x30] sm:$0xff] %vm439_vm2, %v1489_v14  ;;  %v1410_v2 = vpop.xlane.xlu0 %1409  ;;  %v5204_v14 = vsub.f32 %v5202_v45, %v5203_v54  ;;  %v1364_v45 = vmul.f32 %v4598_v61, %v1332_v24 }
 0x3ec   : > { %v1490_v28 = vadd.f32 %v1410_v2, %v1362_v57  ;;  %v1401_v39 = vpop.xlane.xlu1 %1400 }
 0x3ed   : > { %v2103_v58 = vld [vmem:[#allocation3 + $0x18] sm:$0xff]  ;;  %v1487_v49 = vadd.f32 %v1401_v39, %v1359_v50  ;;  %v1033_v57 = vmul.f32 1.442695, %v5204_v14  ;;  %v1365_v50 = vmul.f32 %v4766_v27, %v1333_v37 }
 0x3ee   : > { %3261 = vrcp.f32 %v2103_v58  ;;  %v2102_v16 = vld [vmem:[#allocation3 + $0x10] sm:$0xff]  ;;  %1523 = vst.msk [vmem:[#allocation3 + $0x38] sm:$0xff] %vm439_vm2, %v1490_v28 }
 0x3ef   : > { %3263 = vrcp.f32 %v2102_v16  ;;  %1520 = vst.msk [vmem:[#allocation3 + $0x20] sm:$0xff] %vm439_vm2, %v1487_v49  ;;  %v1404_v4 = vpop.xlane.xlu0 %1403 }
 0x3f0   : > { %v1488_v31 = vadd.f32 %v1404_v4, %v1360_v21  ;;  %3265 = vpow2.f32 %v1031_v32  ;;  %v5207_v32 = vsub.f32 %v5205_v48, %v5206_v20 }
 0x3f1   : > { %v2101_v2 = vld [vmem:[#allocation3 + $0x8] sm:$0xff] }
 0x3f2   : > { %3267 = vrcp.f32 %v2101_v2  ;;  %1521 = vst.msk [vmem:[#allocation3 + $0x28] sm:$0xff] %vm439_vm2, %v1488_v31  ;;  %v2106_v28 = vld [vmem:[#allocation3 + $0x30] sm:$0xff]  ;;  %v1029_v58 = vmul.f32 1.442695, %v5207_v32  ;;  %v1331_v31 = vld [vmem:[#allocation3 + $0x40] sm:$0xff] }
 0x3f3   : > { %3269 = vrcp.f32 %v2100_v60 }
 0x3f4   : > { %3271 = vpow2.f32 %v1027_v35  ;;  %v1419_v39 = vpop.xlane.xlu1 %1418 }
 0x3f5   : > { %3273 = vpow2.f32 %v1033_v57  ;;  %v2107_v49 = vld [vmem:[#allocation3 + $0x38] sm:$0xff]  ;;  %v1493_v16 = vadd.f32 %v1419_v39, %v1365_v50  ;;  %v1363_v57 = vmul.f32 %v4600_v13, %v1331_v31  ;;  %v1337_v39 = vld [vmem:[#allocation3 + $0x70] sm:$0xff] }
 0x3f6   : > { %3275 = vrcp.f32 %v2107_v49  ;;  %v2104_v4 = vld [vmem:[#allocation3 + $0x20] sm:$0xff] }
 0x3f7   : > { %3277 = vrcp.f32 %v2106_v28  ;;  %1526 = vst.msk [vmem:[#allocation3 + $0x50] sm:$0xff] %vm439_vm2, %v1493_v16  ;;  %v1335_v16 = vld [vmem:[#allocation3 + $0x60] sm:$0xff] }
 0x3f8   : > { %v3262_v21 = vpop.eup %3261  ;;  %v1422_v15 = vpop.xlane.xlu0 %1421  ;;  %3279 = vpow2.f32 %v1029_v58  ;;  %v1338_v58 = vld [vmem:[#allocation3 + $0x78] sm:$0xff] }
 0x3f9   : > { %v3264_v53 = vpop.eup %3263  ;;  %v2105_v35 = vld [vmem:[#allocation3 + $0x28] sm:$0xff]  ;;  %v1494_v60 = vadd.f32 %v1422_v15, %v1366_v1  ;;  %2213 = vperm.xlu0 %3147, %v3262_v21  }
 0x3fa   : > { %3281 = vrcp.f32 %v2105_v35  ;;  %2208 = vperm.xlu1 %3146, %v3264_v53   ;;  %v4783_v37 = vpop.eup %3265  ;;  %v1336_v35 = vld [vmem:[#allocation3 + $0x68] sm:$0xff] }
 0x3fb   : > { %3283 = vrcp.f32 %v2104_v4  ;;  %1527 = vst.msk [vmem:[#allocation3 + $0x58] sm:$0xff] %vm439_vm2, %v1494_v60  ;;  %v1369_v61 = vmul.f32 %v4783_v37, %v1337_v39 }
 0x3fc   : > { %v3268_v54 = vpop.eup %3267  ;;  %v1416_v14 = vpop.xlane.xlu0 %1415 }
 0x3fd   : > { %v3270_v2 = vpop.eup %3269  ;;  %v1492_v50 = vadd.f32 %v1416_v14, %v1364_v45  ;;  %v1413_v28 = vpop.xlane.xlu1 %1412  ;;  %2203 = vperm.xlu0 %3147, %v3268_v54  }
 0x3fe   : > { %v4788_v3 = vpop.eup %3271  ;;  %v1491_v48 = vadd.f32 %v1413_v28, %v1363_v57  ;;  %2198 = vperm.xlu1 %3146, %v3270_v2   ;;  %v1341_v2 = vld [vmem:[#allocation3 + $0x90] sm:$0xff]  ;;  %v5208_v28 = vld [vmem:[#allocation50_spill] sm:$0xff] }
 0x3ff   : > { %v4790_v20 = vpop.eup %3273  ;;  %1525 = vst.msk [vmem:[#allocation3 + $0x48] sm:$0xff] %vm439_vm2, %v1492_v50  ;;  %v1367_v53 = vmul.f32 %v4788_v3, %v1335_v16  ;;  %v1373_v39 = vmul.f32 %v5208_v28, %v1341_v2  ;;  %v1344_v2 = vld [vmem:[#allocation3 + $0xa8] sm:$0xff] }
 0x400   : > { %v3276_v32 = vpop.eup %3275  ;;  %1524 = vst.msk [vmem:[#allocation3 + $0x40] sm:$0xff] %vm439_vm2, %v1491_v48  ;;  %v1370_v4 = vmul.f32 %v4790_v20, %v1338_v58 }
 0x401   : > { %v3278_v13 = vpop.eup %3277  ;;  %v1431_v49 = vpop.xlane.xlu1 %1430  ;;  %2233 = vperm.xlu0 %3147, %v3276_v32   ;;  %v1339_v32 = vld [vmem:[#allocation3 + $0x80] sm:$0xff] }
 0x402   : > { %v1497_v1 = vadd.f32 %v1431_v49, %v1369_v61  ;;  %2228 = vperm.xlu1 %3146, %v3278_v13   ;;  %v4795_v21 = vpop.eup %3279  ;;  %v1371_v58 = vmul.f32 %v4528_v25, %v1339_v32  ;;  %v1342_v49 = vld [vmem:[#allocation3 + $0x98] sm:$0xff]  ;;  %v1345_v25 = vld [vmem:[#allocation3 + $0xb0] sm:$0xff] }
 0x403   : > { %v1368_v14 = vmul.f32 %v4795_v21, %v1336_v35 }
 0x404   : > { %v3282_v15 = vpop.eup %3281  ;;  %1530 = vst.msk [vmem:[#allocation3 + $0x70] sm:$0xff] %vm439_vm2, %v1497_v1  ;;  %v1434_v24 = vpop.xlane.xlu0 %1433  ;;  %v1374_v1 = vmul.f32 %v4513_v34, %v1342_v49 }
 0x405   : > { %v3284_v60 = vpop.eup %3283  ;;  %v1498_v31 = vadd.f32 %v1434_v24, %v1370_v4  ;;  %v1425_v45 = vpop.xlane.xlu1 %1424  ;;  %2223 = vperm.xlu0 %3147, %v3282_v15   ;;  %v1340_v15 = vld [vmem:[#allocation3 + $0x88] sm:$0xff] }
 0x406   : > { %v1495_v54 = vadd.f32 %v1425_v45, %v1367_v53  ;;  %2218 = vperm.xlu1 %3146, %v3284_v60   ;;  %v1372_v35 = vmul.f32 %v4541_v36, %v1340_v15 }
 0x407   : > { %1531 = vst.msk [vmem:[#allocation3 + $0x78] sm:$0xff] %vm439_vm2, %v1498_v31  ;;  %v1346_v31 = vld [vmem:[#allocation3 + $0xb8] sm:$0xff]  ;;  %v2108_v36 = vld [vmem:[#allocation3 + $0x40] sm:$0xff] }
 0x408   : > { %1528 = vst.msk [vmem:[#allocation3 + $0x60] sm:$0xff] %vm439_vm2, %v1495_v54  ;;  %v1428_v57 = vpop.xlane.xlu0 %1427 }
 0x409   : > { %v1496_v50 = vadd.f32 %v1428_v57, %v1368_v14  ;;  %v1378_v14 = vmul.f32 %v4573_v23, %v1346_v31  ;;  %v1377_v57 = vmul.f32 %v4588_v18, %v1345_v25  ;;  %v1548_v18 = vld [vmem:[#allocation4] sm:$0xff] }
 0x40b   : > { %1529 = vst.msk [vmem:[#allocation3 + $0x68] sm:$0xff] %vm439_vm2, %v1496_v50 }
 0x40c   : > { %v1443_v48 = vpop.xlane.xlu1 %1442 }
 0x40d   : > { %v1501_v61 = vadd.f32 %v1443_v48, %v1373_v39  ;;  %v1343_v39 = vld [vmem:[#allocation3 + $0xa0] sm:$0xff] }
 0x40e   : > { %v1375_v23 = vmul.f32 %v4571_v17, %v1343_v39  ;;  %v5209_v39 = vsub.f32 %v4530_v44, %v4539_v47  ;;  %v1553_v44 = vld [vmem:[#allocation4 + $0x28] sm:$0xff] }
 0x40f   : > { %1534 = vst.msk [vmem:[#allocation3 + $0x90] sm:$0xff] %vm439_vm2, %v1501_v61  ;;  %v1376_v61 = vmul.f32 %v4590_v22, %v1344_v2  ;;  %v1740_v22 = vmul.f32 %v4625_v5, %v1548_v18 }
 0x410   : > { %v1437_v13 = vpop.xlane.xlu1 %1436 }
 0x411   : > { %v1499_v16 = vadd.f32 %v1437_v13, %v1371_v58  ;;  %v1550_v58 = vld [vmem:[#allocation4 + $0x10] sm:$0xff] }
 0x413   : > { %1532 = vst.msk [vmem:[#allocation3 + $0x80] sm:$0xff] %vm439_vm2, %v1499_v16 }
 0x414   : > { %v1446_v4 = vpop.xlane.xlu0 %1445 }
 0x415   : > { %v1502_v24 = vadd.f32 %v1446_v4, %v1374_v1  ;;  %v1551_v4 = vld [vmem:[#allocation4 + $0x18] sm:$0xff] }
 0x416   : > { %v2118_v53 = vld [vmem:[#allocation3 + $0x90] sm:$0xff]  ;;  %v1743_v31 = vmul.f32 %v4645_v38, %v1551_v4 }
 0x417   : > { %3285 = vrcp.f32 %v2118_v53  ;;  %1535 = vst.msk [vmem:[#allocation3 + $0x98] sm:$0xff] %vm439_vm2, %v1502_v24  ;;  %v1549_v53 = vld [vmem:[#allocation4 + $0x8] sm:$0xff] }
 0x418   : > { %v1440_v60 = vpop.xlane.xlu0 %1439 }
 0x419   : > { %v1500_v45 = vadd.f32 %v1440_v60, %v1372_v35  ;;  %v1742_v35 = vmul.f32 %v4656_v12, %v1550_v58 }
 0x41a   : > { %v2116_v54 = vld [vmem:[#allocation3 + $0x80] sm:$0xff] }
 0x41b   : > { %3287 = vrcp.f32 %v2116_v54  ;;  %1533 = vst.msk [vmem:[#allocation3 + $0x88] sm:$0xff] %vm439_vm2, %v1500_v45  ;;  %v1741_v54 = vmul.f32 %v4651_v46, %v1549_v53 }
 0x41c   : > { %v1458_v34 = vpop.xlane.xlu0 %1457 }
 0x41d   : > { %v1506_v50 = vadd.f32 %v1458_v34, %v1378_v14  ;;  %v1455_v28 = vpop.xlane.xlu1 %1454 }
 0x41e   : > { %v2119_v48 = vld [vmem:[#allocation3 + $0x98] sm:$0xff]  ;;  %v1505_v32 = vadd.f32 %v1455_v28, %v1377_v57 }
 0x41f   : > { %3289 = vrcp.f32 %v2119_v48  ;;  %1539 = vst.msk [vmem:[#allocation3 + $0xb8] sm:$0xff] %vm439_vm2, %v1506_v50  ;;  %v2109_v50 = vld [vmem:[#allocation3 + $0x48] sm:$0xff]  ;;  %v1059_v48 = vmul.f32 1.442695, %v5209_v39 }
 0x420   : > { %1538 = vst.msk [vmem:[#allocation3 + $0xb0] sm:$0xff] %vm439_vm2, %v1505_v32  ;;  %v1452_v13 = vpop.xlane.xlu0 %1451  ;;  %3291 = vrcp.f32 %v2108_v36 }
 0x421   : > { %v3286_v49 = vpop.eup %3285  ;;  %v1504_v16 = vadd.f32 %v1452_v13, %v1376_v61  ;;  %v1449_v1 = vpop.xlane.xlu1 %1448  ;;  %v1554_v61 = vld [vmem:[#allocation4 + $0x30] sm:$0xff]  ;;  %v1552_v13 = vld [vmem:[#allocation4 + $0x20] sm:$0xff] }
 0x422   : > { %v2117_v15 = vld [vmem:[#allocation3 + $0x88] sm:$0xff]  ;;  %v1503_v24 = vadd.f32 %v1449_v1, %v1375_v23  ;;  %2288 = vperm.xlu1 %3146, %v3286_v49   ;;  %v1555_v49 = vld [vmem:[#allocation4 + $0x38] sm:$0xff]  ;;  %v1746_v47 = vmul.f32 %v4731_v56, %v1554_v61  ;;  %v1744_v1 = vmul.f32 %v4693_v7, %v1552_v13 }
 0x423   : > { %3293 = vrcp.f32 %v2117_v15  ;;  %1537 = vst.msk [vmem:[#allocation3 + $0xa8] sm:$0xff] %vm439_vm2, %v1504_v16 }
 0x424   : > { %1536 = vst.msk [vmem:[#allocation3 + $0xa0] sm:$0xff] %vm439_vm2, %v1503_v24  ;;  %v2964_v17 = vpop.f32.mrb[0].mxu1  ;;  %v1747_v24 = vmul.f32 %v4700_v30, %v1555_v49 }
 0x425   : > { %v3288_v60 = vpop.eup %3287  ;;  %v2003_v45 = vadd.f32 %v2964_v17, %v1742_v35  ;;  %v1874_v25 = vpop.f32.mrb[1].mxu1 }
 0x426   : > { %v2001_v14 = vadd.f32 %v1874_v25, %v1740_v22  ;;  %v2965_v34 = vpop.f32.mrb[2].mxu1  ;;  %2278 = vperm.xlu1 %3146, %v3288_v60   ;;  %v2123_v32 = vld [vmem:[#allocation3 + $0xb8] sm:$0xff]  ;;  %v1556_v25 = vld [vmem:[#allocation4 + $0x40] sm:$0xff] }
 0x427   : > { %v2122_v57 = vld [vmem:[#allocation3 + $0xb0] sm:$0xff]  ;;  %2035 = vst.msk [vmem:[#allocation4 + $0x10] sm:$0xff] %vm504_vm1, %v2003_v45  ;;  %v2004_v12 = vadd.f32 %v2965_v34, %v1743_v31  ;;  %v1877_v2 = vpop.f32.mrb[3].mxu1 }
 0x428   : > { %3295 = vrcp.f32 %v2122_v57  ;;  %2033 = vst.msk [vmem:[#allocation4] sm:$0xff] %vm504_vm1, %v2001_v14  ;;  %v2002_v5 = vadd.f32 %v1877_v2, %v1741_v54  ;;  %v1557_v54 = vld [vmem:[#allocation4 + $0x48] sm:$0xff]  ;;  %v1748_v14 = vmul.f32 %v4736_v6, %v1556_v25 }
 0x429   : > { %v3290_v28 = vpop.eup %3289  ;;  %2036 = vst.msk [vmem:[#allocation4 + $0x18] sm:$0xff] %vm504_vm1, %v2004_v12  ;;  %3297 = vrcp.f32 %v2109_v50  ;;  %v1749_v12 = vmul.f32 %v4734_v59, %v1557_v54  ;;  %v5213_v6 = vld [vmem:[#allocation51_spill] sm:$0xff] }
 0x42a   : > { %2034 = vst.msk [vmem:[#allocation4 + $0x8] sm:$0xff] %vm504_vm1, %v2002_v5  ;;  %2293 = vperm.xlu0 %3147, %v3290_v28   ;;  %1632 = vperm.xlu1 %3146, %v4766_v27   ;;  %v3292_v46 = vpop.eup %3291  ;;  %v2121_v58 = vld [vmem:[#allocation3 + $0xa8] sm:$0xff]  ;;  %v5212_v28 = vsub.f32 %v4543_v55, %v4555_v40  ;;  %v1349_v55 = vld [vmem:[#allocation3 + $0xd0] sm:$0xff] }
 0x42b   : > { %v2120_v38 = vld [vmem:[#allocation3 + $0xa0] sm:$0xff]  ;;  %v5210_v27 = vld [vmem:[#allocation47_spill] sm:$0xff]  ;;  %v1381_v13 = vmul.f32 %v4707_v8, %v1349_v55 }
 0x42c   : > { %3299 = vrcp.f32 %v2120_v38  ;;  %v5211_v18 = vsub.f32 %v5210_v27, %v4464_v41  ;;  %v1065_v38 = vmul.f32 1.442695, %v5212_v28 }
 0x42d   : > { %v3294_v36 = vpop.eup %3293  ;;  %3301 = vrcp.f32 %v2123_v32  ;;  %v1350_v32 = vld [vmem:[#allocation3 + $0xd8] sm:$0xff] }
 0x42e   : > { %2283 = vperm.xlu0 %3147, %v3294_v36   ;;  %2238 = vperm.xlu1 %3146, %v3292_v46   ;;  %3303 = vpow2.f32 %v1059_v48  ;;  %v1061_v16 = vmul.f32 1.442695, %v5211_v18  ;;  %v5214_v46 = vsub.f32 %v4515_v19, %v5213_v6  ;;  %v4872_v36 = vpop.permute.xlu1 %1712  ;;  %v1382_v19 = vmul.f32 %v4714_v10, %v1350_v32  ;;  %v1347_v18 = vld [vmem:[#allocation3 + $0xc0] sm:$0xff]  ;;  %v1354_v10 = vld [vmem:[#allocation3 + $0xf8] sm:$0xff] }
 0x42f   : > { %3305 = vrcp.f32 %v2121_v58 }
 0x430   : > { %3307 = vpow2.f32 %v1061_v16  ;;  %v1063_v39 = vmul.f32 1.442695, %v5214_v46 }
 0x431   : > { %3309 = vpow2.f32 %v1065_v38 }
 0x432   : > { %v3296_v23 = vpop.eup %3295  ;;  %1637 = vperm.xlu0 %3147, %v4776_v9   ;;  %v1745_v9 = vmul.f32 %v4668_v29, %v1553_v44  ;;  %3311 = vpow2.f32 %v1063_v39  ;;  %v5215_v44 = vld [vmem:[#allocation53_spill] sm:$0xff] }
 0x433   : > { %2308 = vperm.xlu1 %3146, %v3296_v23   ;;  %v3298_v15 = vpop.eup %3297  ;;  %v1348_v23 = vld [vmem:[#allocation3 + $0xc8] sm:$0xff] }
 0x434   : > { %v2968_v4 = vpop.f32.mrb[4].mxu1 }
 0x435   : > { %v2007_v53 = vadd.f32 %v2968_v4, %v1746_v47  ;;  %v1890_v35 = vpop.f32.mrb[5].mxu1  ;;  %v1380_v47 = vmul.f32 %v5215_v44, %v1348_v23  ;;  %v2110_v44 = vld [vmem:[#allocation3 + $0x50] sm:$0xff] }
 0x436   : > { %v3300_v22 = vpop.eup %3299  ;;  %v2005_v17 = vadd.f32 %v1890_v35, %v1744_v1  ;;  %v2969_v60 = vpop.f32.mrb[6].mxu1  ;;  %2243 = vperm.xlu0 %3147, %v3298_v15   ;;  %v5216_v15 = vld [vmem:[#allocation52_spill] sm:$0xff] }
 0x437   : > { %2039 = vst.msk [vmem:[#allocation4 + $0x30] sm:$0xff] %vm504_vm1, %v2007_v53  ;;  %v2008_v41 = vadd.f32 %v2969_v60, %v1747_v24  ;;  %2298 = vperm.xlu1 %3146, %v3300_v22   ;;  %v1893_v56 = vpop.f32.mrb[7].mxu1  ;;  %v3302_v31 = vpop.eup %3301  ;;  %v1379_v24 = vmul.f32 %v5216_v15, %v1347_v18  ;;  %v1353_v22 = vld [vmem:[#allocation3 + $0xf0] sm:$0xff]  ;;  %v1569_v15 = vld [vmem:[#allocation4 + $0xa8] sm:$0xff] }
 0x438   : > { %2037 = vst.msk [vmem:[#allocation4 + $0x20] sm:$0xff] %vm504_vm1, %v2005_v17  ;;  %v2006_v7 = vadd.f32 %v1893_v56, %v1745_v9  ;;  %v4843_v30 = vpop.eup %3303  ;;  %v1566_v17 = vld [vmem:[#allocation4 + $0x90] sm:$0xff] }
 0x439   : > { %2040 = vst.msk [vmem:[#allocation4 + $0x38] sm:$0xff] %vm504_vm1, %v2008_v41  ;;  %v3306_v29 = vpop.eup %3305  ;;  %v1564_v41 = vld [vmem:[#allocation4 + $0x80] sm:$0xff] }
 0x43a   : > { %2038 = vst.msk [vmem:[#allocation4 + $0x28] sm:$0xff] %vm504_vm1, %v2006_v7  ;;  %2313 = vperm.xlu0 %3147, %v3302_v31   ;;  %v4848_v45 = vpop.eup %3307  ;;  %v1352_v31 = vld [vmem:[#allocation3 + $0xe8] sm:$0xff] }
 0x43b   : > { %1722 = vperm.xlu1 %3146, %v4843_v30   ;;  %v4882_v1 = vpop.eup %3309  ;;  %v1384_v6 = vmul.f32 %v4848_v45, %v1352_v31 }
 0x43c   : > { %v4886_v53 = vpop.eup %3311  ;;  %v1386_v60 = vmul.f32 %v4882_v1, %v1354_v10 }
 0x43d   : > { %v1385_v7 = vmul.f32 %v4886_v53, %v1353_v22 }
 0x43e   : > { %2303 = vperm.xlu0 %3147, %v3306_v29   ;;  %v1567_v29 = vld [vmem:[#allocation4 + $0x98] sm:$0xff] }
 0x43f   : > { %1642 = vperm.xlu1 %3146, %v4788_v3   ;;  %v1759_v46 = vmul.f32 %v4673_v43, %v1567_v29 }
 0x442   : > { %1727 = vperm.xlu0 %3147, %v4848_v45  }
 0x445   : > { %v4852_v34 = vpop.f32.mrb[8].mxu1 }
 0x446   : > { %1647 = vperm.xlu0 %3147, %v4795_v21   ;;  %v1906_v57 = vpop.f32.mrb[9].mxu1  ;;  %v4868_v21 = vpop.permute.xlu0 %1717 }
 0x447   : > { %v2009_v2 = vadd.f32 %v1906_v57, %v1748_v14  ;;  %v4856_v50 = vpop.f32.mrb[10].mxu1  ;;  %v1351_v14 = vld [vmem:[#allocation3 + $0xe0] sm:$0xff]  ;;  %v1758_v57 = vmul.f32 %v4670_v62, %v1566_v17 }
 0x448   : > { %v1909_v5 = vpop.f32.mrb[11].mxu1  ;;  %v1383_v55 = vmul.f32 %v4843_v30, %v1351_v14  ;;  %v2111_v30 = vld [vmem:[#allocation3 + $0x58] sm:$0xff] }
 0x449   : > { %2041 = vst.msk [vmem:[#allocation4 + $0x40] sm:$0xff] %vm504_vm1, %v2009_v2  ;;  %v2010_v3 = vadd.f32 %v1909_v5, %v1749_v12  ;;  %v1565_v12 = vld [vmem:[#allocation4 + $0x88] sm:$0xff] }
 0x44b   : > { %2042 = vst.msk [vmem:[#allocation4 + $0x48] sm:$0xff] %vm504_vm1, %v2010_v3  ;;  %v1756_v3 = vmul.f32 %v4679_v63, %v1564_v41  ;;  %v1761_v41 = vmul.f32 %v4712_v51, %v1569_v15 }
 0x450   : > { %v4866_v59 = vpop.f32.mrb[12].mxu1 }
 0x451   : > { %v4870_v48 = vpop.f32.mrb[13].mxu1 }
 0x452   : > { %v4874_v61 = vpop.f32.mrb[14].mxu1 }
 0x453   : > { %v4876_v40 = vpop.f32.mrb[15].mxu1 }
 0x455   : > { %v1470_v58 = vpop.xlane.xlu0 %1469 }
 0x456   : > { %v1510_v49 = vadd.f32 %v1470_v58, %v1382_v19  ;;  %v1467_v27 = vpop.xlane.xlu1 %1466  ;;  %v1757_v19 = vmul.f32 %v4684_v11, %v1565_v12  ;;  %v1570_v11 = vld [vmem:[#allocation4 + $0xb0] sm:$0xff]  ;;  %v2112_v12 = vld [vmem:[#allocation3 + $0x60] sm:$0xff] }
 0x457   : > { %v1509_v16 = vadd.f32 %v1467_v27, %v1381_v13 }
 0x458   : > { %1543 = vst.msk [vmem:[#allocation3 + $0xd8] sm:$0xff] %vm439_vm2, %v1510_v49 }
 0x459   : > { %1542 = vst.msk [vmem:[#allocation3 + $0xd0] sm:$0xff] %vm439_vm2, %v1509_v16  ;;  %v1464_v4 = vpop.xlane.xlu0 %1463 }
 0x45a   : > { %v1508_v8 = vadd.f32 %v1464_v4, %v1380_v47  ;;  %v1461_v35 = vpop.xlane.xlu1 %1460  ;;  %v1568_v47 = vld [vmem:[#allocation4 + $0xa0] sm:$0xff]  ;;  %v1571_v4 = vld [vmem:[#allocation4 + $0xb8] sm:$0xff] }
 0x45b   : > { %v1507_v9 = vadd.f32 %v1461_v35, %v1379_v24  ;;  %v1762_v24 = vmul.f32 %v4726_v33, %v1570_v11  ;;  %v4928_v11 = vld [vmem:[#allocation13] sm:$0xf] }
 0x45c   : > { %1541 = vst.msk [vmem:[#allocation3 + $0xc8] sm:$0xff] %vm439_vm2, %v1508_v8  ;;  %v1760_v8 = vmul.f32 %v4705_v0, %v1568_v47  ;;  %2924 = vmatprep.mubr.msk.f32.mxu0 %vm504_vm1, %v4928_v11 }
 0x45d   : > { %1540 = vst.msk [vmem:[#allocation3 + $0xc0] sm:$0xff] %vm439_vm2, %v1507_v9  ;;  %v1482_v56 = vpop.xlane.xlu0 %1481  ;;  %v1763_v9 = vmul.f32 %v4703_v26, %v1571_v4 }
 0x45e   : > { %v1514_v25 = vadd.f32 %v1482_v56, %v1386_v60  ;;  %v1479_v54 = vpop.xlane.xlu1 %1478 }
 0x45f   : > { %v2127_v2 = vld [vmem:[#allocation3 + $0xd8] sm:$0xff]  ;;  %v1513_v5 = vadd.f32 %v1479_v54, %v1385_v7 }
 0x460   : > { %3313 = vrcp.f32 %v2127_v2  ;;  %v2126_v28 = vld [vmem:[#allocation3 + $0xd0] sm:$0xff]  ;;  %1547 = vst.msk [vmem:[#allocation3 + $0xf8] sm:$0xff] %vm439_vm2, %v1514_v25  ;;  %v2980_v38 = vpop.f32.mrb[16].mxu1 }
 0x461   : > { %3315 = vrcp.f32 %v2126_v28  ;;  %1546 = vst.msk [vmem:[#allocation3 + $0xf0] sm:$0xff] %vm439_vm2, %v1513_v5  ;;  %v2019_v39 = vadd.f32 %v2980_v38, %v1758_v57  ;;  %v1476_v32 = vpop.xlane.xlu0 %1475  ;;  %v1938_v62 = vpop.f32.mrb[17].mxu1  ;;  %v2113_v57 = vld [vmem:[#allocation3 + $0x68] sm:$0xff]  ;;  %v1574_v2 = vld [vmem:[#allocation4 + $0xd0] sm:$0xff]  ;;  %v1572_v5 = vld [vmem:[#allocation4 + $0xc0] sm:$0xff] }
 0x462   : > { %v1512_v63 = vadd.f32 %v1476_v32, %v1384_v6  ;;  %v2017_v58 = vadd.f32 %v1938_v62, %v1756_v3  ;;  %v1473_v13 = vpop.xlane.xlu1 %1472  ;;  %v2981_v23 = vpop.f32.mrb[18].mxu1  ;;  %v1575_v28 = vld [vmem:[#allocation4 + $0xd8] sm:$0xff]  ;;  %v1573_v6 = vld [vmem:[#allocation4 + $0xc8] sm:$0xff] }
 0x463   : > { %v2125_v49 = vld [vmem:[#allocation3 + $0xc8] sm:$0xff]  ;;  %2051 = vst.msk [vmem:[#allocation4 + $0x90] sm:$0xff] %vm504_vm1, %v2019_v39  ;;  %v1511_v45 = vadd.f32 %v1473_v13, %v1383_v55  ;;  %v2020_v27 = vadd.f32 %v2981_v23, %v1759_v46  ;;  %v1941_v43 = vpop.f32.mrb[19].mxu1  ;;  %v1766_v46 = vmul.f32 %v4872_v36, %v1574_v2  ;;  %v1764_v39 = vmul.f32 %v4741_v52, %v1572_v5  ;;  %v2115_v32 = vld [vmem:[#allocation3 + $0x78] sm:$0xff] }
 0x464   : > { %3317 = vrcp.f32 %v2125_v49  ;;  %v2124_v18 = vld [vmem:[#allocation3 + $0xc0] sm:$0xff]  ;;  %1545 = vst.msk [vmem:[#allocation3 + $0xe8] sm:$0xff] %vm439_vm2, %v1512_v63  ;;  %v2018_v16 = vadd.f32 %v1941_v43, %v1757_v19  ;;  %v1767_v62 = vmul.f32 %v4868_v21, %v1575_v28  ;;  %v1765_v63 = vmul.f32 %v4738_v42, %v1573_v6 }
 0x465   : > { %2049 = vst.msk [vmem:[#allocation4 + $0x80] sm:$0xff] %vm504_vm1, %v2017_v58  ;;  %3319 = vrcp.f32 %v2124_v18  ;;  %2052 = vst.msk [vmem:[#allocation4 + $0x98] sm:$0xff] %vm504_vm1, %v2020_v27  ;;  %v2114_v58 = vld [vmem:[#allocation3 + $0x70] sm:$0xff] }
 0x466   : > { %1544 = vst.msk [vmem:[#allocation3 + $0xe0] sm:$0xff] %vm439_vm2, %v1511_v45  ;;  %3321 = vrcp.f32 %v2111_v30 }
 0x467   : > { %2050 = vst.msk [vmem:[#allocation4 + $0x88] sm:$0xff] %vm504_vm1, %v2018_v16  ;;  %3323 = vrcp.f32 %v2110_v44  ;;  %v2131_v3 = vld [vmem:[#allocation3 + $0xf8] sm:$0xff] }
 0x468   : > { %v2130_v38 = vld [vmem:[#allocation3 + $0xf0] sm:$0xff]  ;;  %v2389_v16 = vld [vmem:[#allocation14] sm:$0xf] }
 0x469   : > { %v2984_v35 = vpop.f32.mrb[20].mxu1 }
 0x46a   : > { %v3314_v10 = vpop.eup %3313  ;;  %v2023_v17 = vadd.f32 %v2984_v35, %v1762_v24  ;;  %v1954_v60 = vpop.f32.mrb[21].mxu1  ;;  %v2182_v28 = vld [vmem:[#allocation4 + $0x90] sm:$0xff] }
 0x46b   : > { %v3316_v22 = vpop.eup %3315  ;;  %2333 = vperm.xlu0 %3147, %v3314_v10   ;;  %v2021_v56 = vadd.f32 %v1954_v60, %v1760_v8  ;;  %v2985_v7 = vpop.f32.mrb[22].mxu1  ;;  %v2129_v26 = vld [vmem:[#allocation3 + $0xe8] sm:$0xff] }
 0x46c   : > { %2328 = vperm.xlu1 %3146, %v3316_v22   ;;  %2055 = vst.msk [vmem:[#allocation4 + $0xb0] sm:$0xff] %vm504_vm1, %v2023_v17  ;;  %v2024_v31 = vadd.f32 %v2985_v7, %v1763_v9  ;;  %v1957_v33 = vpop.f32.mrb[23].mxu1  ;;  %3325 = vrcp.f32 %v2129_v26 }
 0x46d   : > { %2053 = vst.msk [vmem:[#allocation4 + $0xa0] sm:$0xff] %vm504_vm1, %v2021_v56  ;;  %v2022_v0 = vadd.f32 %v1957_v33, %v1761_v41  ;;  %v2128_v54 = vld [vmem:[#allocation3 + $0xe0] sm:$0xff]  ;;  %v1558_v41 = vld [vmem:[#allocation4 + $0x50] sm:$0xff]  ;;  %v2165_v33 = vld [vmem:[#allocation4 + $0x8] sm:$0xff] }
 0x46e   : > { %v3318_v29 = vpop.eup %3317  ;;  %2056 = vst.msk [vmem:[#allocation4 + $0xb8] sm:$0xff] %vm504_vm1, %v2024_v31  ;;  %3327 = vrcp.f32 %v2128_v54  ;;  %v2183_v54 = vld [vmem:[#allocation4 + $0x98] sm:$0xff] }
 0x46f   : > { %v3320_v25 = vpop.eup %3319  ;;  %2323 = vperm.xlu0 %3147, %v3318_v29   ;;  %2054 = vst.msk [vmem:[#allocation4 + $0xa8] sm:$0xff] %vm504_vm1, %v2022_v0  ;;  %3329 = vrcp.f32 %v2113_v57  ;;  %v2164_v29 = vld [vmem:[#allocation4] sm:$0xff]  ;;  %v2181_v57 = vld [vmem:[#allocation4 + $0x88] sm:$0xff] }
 0x470   : > { %2318 = vperm.xlu1 %3146, %v3320_v25   ;;  %v3322_v51 = vpop.eup %3321  ;;  %3331 = vrcp.f32 %v2112_v12 }
 0x471   : > { %v3324_v14 = vpop.eup %3323  ;;  %3333 = vrcp.f32 %v2131_v3 }
 0x472   : > { %3335 = vrcp.f32 %v2130_v38  ;;  %v1559_v38 = vld [vmem:[#allocation4 + $0x58] sm:$0xff] }
 0x473   : > { %2253 = vperm.xlu0 %3147, %v3322_v51   ;;  %3337 = vrcp.f32 %v2115_v32  ;;  %v2180_v51 = vld [vmem:[#allocation4 + $0x80] sm:$0xff] }
 0x474   : > { %2248 = vperm.xlu1 %3146, %v3324_v14   ;;  %3339 = vrcp.f32 %v2114_v58 }
 0x476   : > { %v3326_v19 = vpop.eup %3325 }
 0x477   : > { %1737 = vperm.xlu0 %3147, %v4882_v1  }
 0x478   : > { %1732 = vperm.xlu1 %3146, %v4886_v53   ;;  %v3328_v23 = vpop.eup %3327  ;;  %v2214_v15 = vpop.permute.xlu0 %2213 }
 0x479   : > { %v3330_v21 = vpop.eup %3329  ;;  %v2209_v18 = vpop.permute.xlu1 %2208 }
 0x47a   : > { %v3332_v42 = vpop.eup %3331 }
 0x47b   : > { %1657 = vperm.xlu0 %3147, %v4790_v20   ;;  %v3334_v49 = vpop.eup %3333 }
 0x47c   : > { %1652 = vperm.xlu1 %3146, %v4783_v37   ;;  %v2988_v1 = vpop.f32.mrb[24].mxu1  ;;  %v3336_v45 = vpop.eup %3335 }
 0x47d   : > { %v2027_v53 = vadd.f32 %v2988_v1, %v1766_v46  ;;  %v1970_v55 = vpop.f32.mrb[25].mxu1  ;;  %v3338_v27 = vpop.eup %3337 }
 0x47e   : > { %v2025_v13 = vadd.f32 %v1970_v55, %v1764_v39  ;;  %v2989_v36 = vpop.f32.mrb[26].mxu1  ;;  %v3340_v43 = vpop.eup %3339  ;;  %v2167_v55 = vld [vmem:[#allocation4 + $0x18] sm:$0xff] }
 0x47f   : > { %2059 = vst.msk [vmem:[#allocation4 + $0xd0] sm:$0xff] %vm504_vm1, %v2027_v53  ;;  %v2028_v52 = vadd.f32 %v2989_v36, %v1767_v62  ;;  %2343 = vperm.xlu0 %3147, %v3326_v19   ;;  %v1973_v20 = vpop.f32.mrb[27].mxu1  ;;  %v2199_v44 = vpop.permute.xlu1 %2198  ;;  %v2166_v19 = vld [vmem:[#allocation4 + $0x10] sm:$0xff]  ;;  %v2359_v58 = vmul.f32 %v2214_v15, %v2167_v55 }
 0x480   : > { %2057 = vst.msk [vmem:[#allocation4 + $0xc0] sm:$0xff] %vm504_vm1, %v2025_v13  ;;  %v2026_v37 = vadd.f32 %v1973_v20, %v1765_v63  ;;  %2338 = vperm.xlu1 %3146, %v3328_v23   ;;  %v2204_v8 = vpop.permute.xlu0 %2203  ;;  %v2356_v26 = vmul.f32 %v2199_v44, %v2164_v29  ;;  %v2358_v13 = vmul.f32 %v2209_v18, %v2166_v19  ;;  %v2187_v44 = vld [vmem:[#allocation4 + $0xb8] sm:$0xff]  ;;  %v2172_v19 = vld [vmem:[#allocation4 + $0x40] sm:$0xff] }
 0x481   : > { %2060 = vst.msk [vmem:[#allocation4 + $0xd8] sm:$0xff] %vm504_vm1, %v2028_v52  ;;  %v2357_v25 = vmul.f32 %v2204_v8, %v2165_v33  ;;  %v1576_v52 = vld [vmem:[#allocation4 + $0xe0] sm:$0xff]  ;;  %v2185_v8 = vld [vmem:[#allocation4 + $0xa8] sm:$0xff] }
 0x482   : > { %2058 = vst.msk [vmem:[#allocation4 + $0xc8] sm:$0xff] %vm504_vm1, %v2026_v37  ;;  %v3003_v20 = vpack.c.bf16 %v2359_v58, %v2358_v13  ;;  %v1577_v33 = vld [vmem:[#allocation4 + $0xe8] sm:$0xff] }
 0x483   : > { %2263 = vperm.xlu0 %3147, %v3330_v21   ;;  %v4938_v10 = vpop.permute.xlu1 %2228  ;;  %v2997_v39 = vpack.c.bf16 %v2357_v25, %v2356_v26 }
 0x484   : > { %2258 = vperm.xlu1 %3146, %v3332_v42   ;;  %v4940_v22 = vpop.permute.xlu0 %2233 }
 0x487   : > { %2353 = vperm.xlu0 %3147, %v3334_v49   ;;  %v2219_v35 = vpop.permute.xlu1 %2218  ;;  %v2169_v49 = vld [vmem:[#allocation4 + $0x28] sm:$0xff] }
 0x488   : > { %2348 = vperm.xlu1 %3146, %v3336_v45   ;;  %v2224_v17 = vpop.permute.xlu0 %2223  ;;  %v2168_v45 = vld [vmem:[#allocation4 + $0x20] sm:$0xff] }
 0x48b   : > { %2273 = vperm.xlu0 %3147, %v3338_v27   ;;  %v2361_v27 = vmul.f32 %v2224_v17, %v2169_v49 }
 0x48c   : > { %2268 = vperm.xlu1 %3146, %v3340_v43   ;;  %v2360_v43 = vmul.f32 %v2219_v35, %v2168_v45 }
 0x48e   : > { %v3009_v25 = vpack.c.bf16 %v2361_v27, %v2360_v43 }
 0x490   : > { %2392 = vperm.xlu1 %3146, %v2389_v16   ;;  %v4926_v30 = vpop.f32.mrb[28].mxu1  ;;  %v2184_v16 = vld [vmem:[#allocation4 + $0xa0] sm:$0xff] }
 0x491   : > { %v4930_v47 = vpop.f32.mrb[29].mxu1 }
 0x492   : > { %v4934_v4 = vpop.f32.mrb[30].mxu1 }
 0x493   : > { %v4936_v24 = vpop.f32.mrb[31].mxu1 }
 0x4a1   : > { %v2289_v9 = vpop.permute.xlu1 %2288 }
 0x4a5   : > { %v2279_v60 = vpop.permute.xlu1 %2278 }
 0x4a6   : > { %v2372_v2 = vmul.f32 %v2279_v60, %v2180_v51 }
 0x4a9   : > { %v2294_v56 = vpop.permute.xlu0 %2293  ;;  %v1633_v7 = vpop.permute.xlu1 %1632 }
 0x4aa   : > { %v1750_v31 = vmul.f32 %v1633_v7, %v1558_v41  ;;  %v2375_v5 = vmul.f32 %v2294_v56, %v2183_v54  ;;  %v2186_v7 = vld [vmem:[#allocation4 + $0xb0] sm:$0xff]  ;;  %v2171_v54 = vld [vmem:[#allocation4 + $0x38] sm:$0xff] }
 0x4ac   : > { %v2011_v0 = vadd.f32 %v4852_v34, %v1750_v31  ;;  %v2374_v34 = vmul.f32 %v2289_v9, %v2182_v28 }
 0x4ad   : > { %v2284_v14 = vpop.permute.xlu0 %2283  ;;  %v4943_v12 = vpop.permute.xlu1 %2238 }
 0x4ae   : > { %2043 = vst.msk [vmem:[#allocation4 + $0x50] sm:$0xff] %vm504_vm1, %v2011_v0  ;;  %v2373_v3 = vmul.f32 %v2284_v14, %v2181_v57  ;;  %v3000_v32 = vpack.c.bf16 %v2375_v5, %v2374_v34  ;;  %v2170_v14 = vld [vmem:[#allocation4 + $0x30] sm:$0xff]  ;;  %v2364_v13 = vmul.f32 %v4943_v12, %v2172_v19 }
 0x4b0   : > { %v2994_v46 = vpack.c.bf16 %v2373_v3, %v2372_v2  ;;  %v2362_v2 = vmul.f32 %v4938_v10, %v2170_v14  ;;  %v2190_v10 = vld [vmem:[#allocation4 + $0xd0] sm:$0xff] }
 0x4b1   : > { %v1638_v1 = vpop.permute.xlu0 %1637 }
 0x4b2   : > { %v1751_v62 = vmul.f32 %v1638_v1, %v1559_v38  ;;  %v2309_v53 = vpop.permute.xlu1 %2308  ;;  %2996 = vmatprep.subr.msk.bf16.mxu0 %vm4948_vm4, %v2994_v46  ;;  %v2173_v46 = vld [vmem:[#allocation4 + $0x48] sm:$0xff] }
 0x4b3   : > { %2999 = vmatpush3.bf16.xpose.msk.msra.mxu0 %vm4948_vm4, %v2997_v39  ;;  %v2378_v29 = vmul.f32 %v2309_v53, %v2186_v7  ;;  %v2189_v1 = vld [vmem:[#allocation4 + $0xc8] sm:$0xff]  ;;  %v2188_v53 = vld [vmem:[#allocation4 + $0xc0] sm:$0xff] }
 0x4b4   : > { %v2012_v63 = vadd.f32 %v4856_v50, %v1751_v62  ;;  %3002 = vmatprep.subr.msk.bf16.mxu0 %vm4948_vm4, %v3000_v32  ;;  %v1560_v50 = vld [vmem:[#allocation4 + $0x60] sm:$0xff]  ;;  %v2191_v32 = vld [vmem:[#allocation4 + $0xd8] sm:$0xff] }
 0x4b5   : > { %v2244_v36 = vpop.permute.xlu0 %2243  ;;  %v2174_v45 = vld [vmem:[#allocation4 + $0x50] sm:$0xff] }
 0x4b6   : > { %2044 = vst.msk [vmem:[#allocation4 + $0x58] sm:$0xff] %vm504_vm1, %v2012_v63  ;;  %v2299_v23 = vpop.permute.xlu1 %2298 }
 0x4b7   : > { %v2376_v9 = vmul.f32 %v2299_v23, %v2184_v16 }
 0x4b9   : > { %v2314_v37 = vpop.permute.xlu0 %2313 }
 0x4ba   : > { %v1723_v21 = vpop.permute.xlu1 %1722  ;;  %v2379_v60 = vmul.f32 %v2314_v37, %v2187_v44 }
 0x4bb   : > { %v1768_v42 = vmul.f32 %v1723_v21, %v1576_v52  ;;  %3005 = vmatpush3.bf16.xpose.msk.msra.mxu0 %vm4948_vm4, %v3003_v20 }
 0x4bc   : > { %v3012_v26 = vpack.c.bf16 %v2379_v60, %v2378_v29 }
 0x4bd   : > { %v2029_v18 = vadd.f32 %v4930_v47, %v1768_v42  ;;  %v2304_v15 = vpop.permute.xlu0 %2303  ;;  %v1561_v47 = vld [vmem:[#allocation4 + $0x68] sm:$0xff]  ;;  %v1578_v42 = vld [vmem:[#allocation4 + $0xf0] sm:$0xff]  ;;  %v2175_v49 = vld [vmem:[#allocation4 + $0x58] sm:$0xff] }
 0x4be   : > { %v2377_v41 = vmul.f32 %v2304_v15, %v2185_v8  ;;  %v1643_v56 = vpop.permute.xlu1 %1642  ;;  %v1562_v8 = vld [vmem:[#allocation4 + $0x70] sm:$0xff] }
 0x4bf   : > { %2061 = vst.msk [vmem:[#allocation4 + $0xe0] sm:$0xff] %vm504_vm1, %v2029_v18  ;;  %v1752_v31 = vmul.f32 %v1643_v56, %v1560_v50  ;;  %v1563_v18 = vld [vmem:[#allocation4 + $0x78] sm:$0xff] }
 0x4c0   : > { %v3006_v0 = vpack.c.bf16 %v2377_v41, %v2376_v9 }
 0x4c1   : > { %v2013_v35 = vadd.f32 %v4870_v48, %v1752_v31  ;;  %v1728_v17 = vpop.permute.xlu0 %1727  ;;  %v2363_v48 = vmul.f32 %v4940_v22, %v2171_v54  ;;  %v2365_v22 = vmul.f32 %v2244_v36, %v2173_v46  ;;  %v1579_v36 = vld [vmem:[#allocation4 + $0xf8] sm:$0xff] }
 0x4c2   : > { %v1769_v51 = vmul.f32 %v1728_v17, %v1577_v33  ;;  %3008 = vmatprep.subr.msk.bf16.mxu0 %vm4948_vm4, %v3006_v0 }
 0x4c3   : > { %2045 = vst.msk [vmem:[#allocation4 + $0x60] sm:$0xff] %vm504_vm1, %v2013_v35  ;;  %3011 = vmatpush3.bf16.xpose.msk.msra.mxu0 %vm4948_vm4, %v3009_v25  ;;  %v3015_v38 = vpack.c.bf16 %v2363_v48, %v2362_v2  ;;  %v3021_v20 = vpack.c.bf16 %v2365_v22, %v2364_v13 }
 0x4c4   : > { %v2030_v57 = vadd.f32 %v4936_v24, %v1769_v51  ;;  %3014 = vmatprep.subr.msk.bf16.mxu0 %vm4948_vm4, %v3012_v26 }
 0x4c5   : > { %v1648_v5 = vpop.permute.xlu0 %1647 }
 0x4c6   : > { %2062 = vst.msk [vmem:[#allocation4 + $0xe8] sm:$0xff] %vm504_vm1, %v2030_v57  ;;  %v1753_v3 = vmul.f32 %v1648_v5, %v1561_v47  ;;  %v2192_v25 = vld [vmem:[#allocation4 + $0xe0] sm:$0xff] }
 0x4c8   : > { %v2014_v28 = vadd.f32 %v4876_v40, %v1753_v3 }
 0x4ca   : > { %2046 = vst.msk [vmem:[#allocation4 + $0x68] sm:$0xff] %vm504_vm1, %v2014_v28 }
 0x4cb   : > { %3017 = vmatpush3.bf16.xpose.msk.msra.mxu0 %vm4948_vm4, %v3015_v38 }
 0x4cd   : > { %v2193_v0 = vld [vmem:[#allocation4 + $0xe8] sm:$0xff] }
 0x4d1   : > { %v2177_v47 = vld [vmem:[#allocation4 + $0x68] sm:$0xff] }
 0x4ea   : > { %v2334_v24 = vpop.permute.xlu0 %2333 }
 0x4eb   : > { %v2329_v34 = vpop.permute.xlu1 %2328  ;;  %v2383_v63 = vmul.f32 %v2334_v24, %v2191_v32 }
 0x4ec   : > { %v2382_v40 = vmul.f32 %v2329_v34, %v2190_v10 }
 0x4ee   : > { %v2324_v39 = vpop.permute.xlu0 %2323  ;;  %v3024_v21 = vpack.c.bf16 %v2383_v63, %v2382_v40 }
 0x4ef   : > { %v2381_v62 = vmul.f32 %v2324_v39, %v2189_v1  ;;  %v2319_v55 = vpop.permute.xlu1 %2318 }
 0x4f0   : > { %v2380_v58 = vmul.f32 %v2319_v55, %v2188_v53 }
 0x4f2   : > { %v3018_v23 = vpack.c.bf16 %v2381_v62, %v2380_v58  ;;  %v2254_v52 = vpop.permute.xlu0 %2253  ;;  %v2565_v62 = vld [vmem:[%s3954_s12] sm:$0xff] }
 0x4f3   : > { %v2249_v37 = vpop.permute.xlu1 %2248  ;;  %v2367_v12 = vmul.f32 %v2254_v52, %v2175_v49  ;;  %v2567_v19 = vcombine.high %v2565_v62, %v2565_v62 }
 0x4f4   : > { %3020 = vmatprep.subr.msk.bf16.mxu0 %vm4948_vm4, %v3018_v23  ;;  %v2366_v27 = vmul.f32 %v2249_v37, %v2174_v45 }
 0x4f5   : > { %3023 = vmatpush3.bf16.xpose.msk.msra.mxu0 %vm4948_vm4, %v3021_v20 }
 0x4f6   : > { %3026 = vmatprep.subr.msk.bf16.mxu0 %vm4948_vm4, %v3024_v21  ;;  %v1738_v50 = vpop.permute.xlu0 %1737  ;;  %v3027_v41 = vpack.c.bf16 %v2367_v12, %v2366_v27 }
 0x4f7   : > { %v1771_v43 = vmul.f32 %v1738_v50, %v1579_v36  ;;  %v1733_v16 = vpop.permute.xlu1 %1732 }
 0x4f8   : > { %v1770_v44 = vmul.f32 %v1733_v16, %v1578_v42 }
 0x4f9   : > { %v2032_v15 = vadd.f32 %v4934_v4, %v1771_v43 }
 0x4fa   : > { %v2031_v9 = vadd.f32 %v4926_v30, %v1770_v44  ;;  %v1658_v60 = vpop.permute.xlu0 %1657 }
 0x4fb   : > { %2064 = vst.msk [vmem:[#allocation4 + $0xf8] sm:$0xff] %vm504_vm1, %v2032_v15  ;;  %v1755_v56 = vmul.f32 %v1658_v60, %v1563_v18  ;;  %v1653_v7 = vpop.permute.xlu1 %1652 }
 0x4fc   : > { %2063 = vst.msk [vmem:[#allocation4 + $0xf0] sm:$0xff] %vm504_vm1, %v2031_v9  ;;  %v1754_v31 = vmul.f32 %v1653_v7, %v1562_v8 }
 0x4fd   : > { %v2016_v33 = vadd.f32 %v4874_v61, %v1755_v56  ;;  %3029 = vmatpush3.bf16.xpose.msk.msra.mxu0 %vm4948_vm4, %v3027_v41  ;;  %v2176_v61 = vld [vmem:[#allocation4 + $0x60] sm:$0xff] }
 0x4fe   : > { %v2015_v29 = vadd.f32 %v4866_v59, %v1754_v31  ;;  %v2344_v4 = vpop.permute.xlu0 %2343 }
 0x4ff   : > { %2048 = vst.msk [vmem:[#allocation4 + $0x78] sm:$0xff] %vm504_vm1, %v2016_v33  ;;  %v2385_v30 = vmul.f32 %v2344_v4, %v2193_v0  ;;  %v2339_v35 = vpop.permute.xlu1 %2338 }
 0x500   : > { %2047 = vst.msk [vmem:[#allocation4 + $0x70] sm:$0xff] %vm504_vm1, %v2015_v29  ;;  %v2384_v17 = vmul.f32 %v2339_v35, %v2192_v25 }
 0x502   : > { %v3030_v26 = vpack.c.bf16 %v2385_v30, %v2384_v17  ;;  %v2264_v51 = vpop.permute.xlu0 %2263  ;;  %v2195_v2 = vld [vmem:[#allocation4 + $0xf8] sm:$0xff] }
 0x503   : > { %v2369_v54 = vmul.f32 %v2264_v51, %v2177_v47  ;;  %v2259_v14 = vpop.permute.xlu1 %2258  ;;  %v2194_v3 = vld [vmem:[#allocation4 + $0xf0] sm:$0xff] }
 0x504   : > { %v2368_v57 = vmul.f32 %v2259_v14, %v2176_v61  ;;  %3032 = vmatprep.subr.msk.bf16.mxu0 %vm4948_vm4, %v3030_v26 }
 0x506   : > { %v3033_v59 = vpack.c.bf16 %v2369_v54, %v2368_v57  ;;  %v2354_v48 = vpop.permute.xlu0 %2353  ;;  %v2179_v46 = vld [vmem:[#allocation4 + $0x78] sm:$0xff] }
 0x507   : > { %v2387_v5 = vmul.f32 %v2354_v48, %v2195_v2  ;;  %v2349_v28 = vpop.permute.xlu1 %2348  ;;  %v2178_v1 = vld [vmem:[#allocation4 + $0x70] sm:$0xff] }
 0x508   : > { %v2386_v38 = vmul.f32 %v2349_v28, %v2194_v3  ;;  %3035 = vmatpush3.bf16.xpose.msk.msra.mxu0 %vm4948_vm4, %v3033_v59 }
 0x50a   : > { %v3036_v24 = vpack.c.bf16 %v2387_v5, %v2386_v38  ;;  %v2274_v34 = vpop.permute.xlu0 %2273 }
 0x50b   : > { %v2371_v39 = vmul.f32 %v2274_v34, %v2179_v46  ;;  %v2269_v22 = vpop.permute.xlu1 %2268 }
 0x50c   : > { %v2370_v32 = vmul.f32 %v2269_v22, %v2178_v1  ;;  %3038 = vmatprep.subr.msk.bf16.mxu0 %vm4948_vm4, %v3036_v24 }
 0x50e   : > { %v3039_v10 = vpack.c.bf16 %v2371_v39, %v2370_v32 }
 0x50f   : > { %v2393_v53 = vpop.permute.xlu1 %2392 }
 0x510   : > { %3041 = vmatpush3.bf16.xpose.msk.msra.mxu0 %vm4948_vm4, %v3039_v10 }
 0x517   : > { %2925 = vmatmul.mubr.msk.f32.vlgmr.msra.gmra.mrb[32].mxu0 %vm504_vm1, %v4928_v11 }
 0x5ea   : > { %v2560_v55 = vpop.f32.mrb[32].mxu0 }
 0x5eb   : > { %v2561_v63 = vadd.f32 %v2560_v55, %v2393_v53  ;;  %v2562_v40 = vpop.f32.mrb[33].mxu0 }
 0x5ec   : > { %v2563_v58 = vadd.f32 %v2562_v40, %v2393_v53 }
 0x5ed   : > { %v2569_v13 = vadd.f32 %v2565_v62, %v2561_v63 }
 0x5ee   : > { %v2570_v23 = vadd.f32 %v2567_v19, %v2563_v58 }
 0x5f0   : > { %v2573_v6 = vcombine.low %v2569_v13, %v2570_v23 }
 0x5f2   : > { %2575 = vst [vmem:[%s430_s30] sm:$0xff] %v2573_v6 }
 0x5f3   : > { %3530 = shalt.err (!%p3527_p9)
}
 0x5f4   : > { %s3531_s17 = scalar_lea.hbm %s5014_s14, 128  ;;  %s3535_s10 = scalar_lea.hbm %s5069_s6, 256 }
 0x5f5   : > { %p3532_p4 = scmp.ne.s32.totalorder %s5014_s14, %s3531_s17  ;;  %p3536_p3 = scmp.lt.u32.totalorder %s5014_s14, %s5069_s6 }
 0x5f6   : > { %p3537_p8 = scmp.lt.u32.totalorder %s3535_s10, %s3531_s17  ;;  %p3539_p2 = scmp.lt.u32.totalorder %s3531_s17, %s5014_s14 }
 0x5f7   : > { %p3533_p1 = pnand %p3532_p4, %p5219_p13 }
 0x5f8   : > { %p3538_p6 = por %p3537_p8, %p3536_p3 }
 0x5f9   : > { %p3534_p11 = pneg %p3533_p1 }
 0x5fa   : > { %p3540_p5 = por %p3539_p2, %p3538_p6 }
 0x5fc   : > { %p3541_p10 = pnand %p3540_p5, %p3534_p11 }
 0x5fe   : > { %3544 = shalt.err (!%p3541_p10)
}
 0x5ff   : > { %3060 = dma.vmem_to_hbm [thread:$0]  (%p5219_p13), %s5016_s16, 128, %s5014_s14, %s2577_s13  }
 0x600 PF: > { %s5220_s18 = sld [smem:[#allocation23_spill]]  ;;  %s5221_s23 = sld [smem:[#allocation25_spill]] }
 0x601   : > { %p5223_p7 = scmp.ge.s32.totalorder %s3615_s26, 2 }
 0x606   : > { %s2605_s11 = sand.u32 1, %s5220_s18   ;;  %p5222_p12 = scmp.ne.s32.totalorder %s5221_s23, 0 }
 0x607   : > { %s2606_s28 = scalar_lea.sflag [#allocation7], %s2605_s11 }
 0x608   : > { %p3083_p0 = pnand %p5223_p7, %p5222_p12 }
 0x60a   : > { %3590 = dma.done.wait (!%p3083_p0), %s2606_s28, 128  }
 0x60b   : > { %3592 = vsyncadd (!%p3083_p0), %s2606_s28, 4294967168  ;;  %s29_s26 = sadd.s32 1, %s3615_s26   ;;  %s5224_s12 = sld [smem:[#allocation24_spill]] }
 0x60c   : > { %p26_p9 = scmp.ge.s32.totalorder %s29_s26, 4   ;;  %s5225_s23 = sld [smem:[#allocation27_spill]] }
 0x60d   : > { %s5226_s7 = sld [smem:[#allocation26_spill]]  ;;  %s5227_s21 = smov %s3599_s22 }
 0x60e   : > { %s5229_s24 = smov %s3611_s25  ;;  %28 = sbr.rel (!%p26_p9) target bundleno = 14 (0xe), region = 142 }
 0x611   : > { %s5228_s22 = smov %s5224_s12 }
 0x613   : > { %s5230_s25 = smov %s5226_s7 }
 0x615   :  { %2611 = vsyncpa [#allocation6], 1 }
 0x616   :  { %2613 = vsyncpa [#allocation6 + $0x1], 1 }
 0x617   :  { %2614 = vsyncpa [#allocation9], 1 }
 0x618   :  { %2616 = vsyncpa [#allocation9 + $0x1], 1 }
 0x619   :  { %2617 = vsyncpa [#allocation12], 1 }
 0x61a   :  { %2619 = vsyncpa [#allocation12 + $0x1], 1 }
 0x61b   :  { %2620 = vsyncpa [#allocation15], 1 }
 0x61c   :  { %2621 = vsyncpa [#allocation7], 1 }
 0x61d   :  { %2623 = vsyncpa [#allocation7 + $0x1], 1 }

</bundles_post_ra>
